<compile_context>
chip_gen: v7x
topology: tpu7x:2x2x1
jax: 0.10.0
libtpu: 0.0.40
codegen_flags: <defaults>
</compile_context>

<pallas_src>
import jax
import jax.numpy as jnp
from jax.experimental import pallas as pl
from jax.experimental.pallas import tpu as pltpu

# (in_features, out_features) for the 8 Linear layers, encoder then decoder.
LAYER_DIMS = [
    (28 * 28, 128), (128, 64), (64, 12), (12, 3),      # encoder
    (3, 12), (12, 64), (64, 128), (128, 28 * 28),      # decoder
]
NUM_LAYERS = len(LAYER_DIMS)
IN_DIM = 28 * 28          # 784


def _round_up(x, m):
    return (x + m - 1) // m * m


def _auto_kernel(x_ref, *refs):
    """refs = (w1, b1, ..., w8, b8, out_ref)."""
    out_ref = refs[-1]
    param_refs = refs[:-1]

    h = x_ref[...]                                   # compute dtype (bf16), no cast
    for layer in range(NUM_LAYERS):
        w = param_refs[2 * layer][...]               # bf16 (or f32) weights
        b = param_refs[2 * layer + 1][...]           # f32 bias, shape (1, out)
        # bf16 x bf16 -> f32 accumulate on the MXU; bias add + tanh in f32.
        acc = jnp.dot(h.astype(w.dtype), w,
                      preferred_element_type=jnp.float32) + b
        if layer != NUM_LAYERS - 1:                  # tanh on all but the last
            h = jnp.tanh(acc).astype(w.dtype)        # back to compute dtype
        else:
            out_ref[...] = acc.astype(out_ref.dtype)


def _prepare_params(params, compute_dtype):
    """Cast weights to the compute dtype; biases stay f32, shaped (1, out)."""
    prepped = []
    for idx in range(NUM_LAYERS):
        w = params[2 * idx].astype(compute_dtype)
        b = params[2 * idx + 1].reshape(1, -1).astype(jnp.float32)
        prepped += [w, b]
    return prepped


def auto_forward(x, params, *, batch_tile=512, min_grid_steps=2, use_bf16=True):
    """x: (B, 784).  params: flat list [w1, b1, ..., w8, b8] (PyTorch-transposed W)."""
    B, D_in = x.shape
    assert D_in == IN_DIM
    compute_dtype = jnp.bfloat16 if use_bf16 else jnp.float32
    sub = 16 if use_bf16 else 8                       # sublane packing granularity

    # Tile selection: pad the batch only to the sublane granularity, then pick
    # a step count that (a) respects batch_tile, (b) gives v7x's 2 TCs work.
    B_pad = _round_up(B, sub)
    max_steps = B_pad // sub
    steps = pl.cdiv(B_pad, max(batch_tile, sub))
    steps = min(max(steps, min_grid_steps), max_steps)
    bt = _round_up(pl.cdiv(B_pad, steps), sub)
    steps = pl.cdiv(B_pad, bt)                        # rounding bt may drop a step
    B_full = bt * steps                               # <= B + 15 + 16*(steps-1)

    x_p = x
    if B_full != B:
        x_p = jnp.pad(x_p, ((0, B_full - B), (0, 0)))
    x_p = x_p.astype(compute_dtype)                   # fuses with the pad in XLA

    prepped = _prepare_params(params, compute_dtype)

    # x / out tiled along batch only; all weights & biases loaded whole (tiny).
    in_specs = [pl.BlockSpec((bt, IN_DIM), lambda i: (i, 0))]
    for p in prepped:
        in_specs.append(pl.BlockSpec(p.shape, lambda i: (0, 0)))
    out_spec = pl.BlockSpec((bt, IN_DIM), lambda i: (i, 0))

    # Advisory cost estimate for XLA's scheduler.
    flops = 2 * B_full * sum(m * n for m, n in LAYER_DIMS)
    transcendentals = B_full * sum(n for _, n in LAYER_DIMS[:-1])
    bytes_accessed = (B_full * IN_DIM * (jnp.dtype(compute_dtype).itemsize + 4)
                      + sum(int(p.size) * p.dtype.itemsize for p in prepped))

    out = pl.pallas_call(
        _auto_kernel,
        out_shape=jax.ShapeDtypeStruct((B_full, IN_DIM), jnp.float32),
        grid_spec=pltpu.PrefetchScalarGridSpec(
            num_scalar_prefetch=0,
            grid=(steps,),
            in_specs=in_specs,
            out_specs=out_spec,
        ),
        compiler_params=pltpu.CompilerParams(
            dimension_semantics=("parallel",),
            vmem_limit_bytes=32 * 1024 * 1024,
        ),
        cost_estimate=pl.CostEstimate(
            flops=flops,
            transcendentals=transcendentals,
            bytes_accessed=bytes_accessed,
        ),
    )(x_p, *prepped)

    if B_full != B:
        out = out[:B]                                 # no-op when B is aligned
    return out


def init_params(key):
    """Deterministic init mimicking PyTorch's U(-1/sqrt(fan_in), 1/sqrt(fan_in))."""
    params = []
    for (fan_in, fan_out) in LAYER_DIMS:
        key, kw, kb = jax.random.split(key, 3)
        bound = 1.0 / jnp.sqrt(jnp.float32(fan_in))
        w = jax.random.uniform(kw, (fan_in, fan_out), jnp.float32, -bound, bound)
        b = jax.random.uniform(kb, (1, fan_out), jnp.float32, -bound, bound)
        params += [w, b]
    return params


def auto_forward_ref(x, params, use_bf16=True):
    """Pure-JAX reference; with use_bf16=True it matches the kernel's casts."""
    compute_dtype = jnp.bfloat16 if use_bf16 else jnp.float32
    h = x
    for layer in range(NUM_LAYERS):
        w = params[2 * layer].astype(compute_dtype)
        b = params[2 * layer + 1].reshape(1, -1).astype(jnp.float32)
        h = jnp.dot(h.astype(compute_dtype), w,
                    preferred_element_type=jnp.float32) + b
        if layer != NUM_LAYERS - 1:
            h = jnp.tanh(h)
    return h


if __name__ == "__main__":
    key = jax.random.PRNGKey(0)
    key, kx = jax.random.split(key)

    B = 64
    x = jax.random.normal(kx, (B, IN_DIM), jnp.float32)
    params = init_params(key)

    # Default path: bf16 compute, batch 64 -> 2 parallel grid steps of 32 rows.
    out = jax.block_until_ready(auto_forward(x, params))

    ref_bf16 = auto_forward_ref(x, params, use_bf16=True)   # matches kernel math
    ref_f32 = auto_forward_ref(x, params, use_bf16=False)   # full-precision sanity

    assert out.shape == (B, IN_DIM)
    assert jnp.allclose(out, ref_bf16, atol=1e-3, rtol=1e-3), "mismatch vs matched ref"
    assert jnp.allclose(out, ref_f32, atol=5e-2, rtol=5e-2), "drifted from f32 reference"

    # Ragged batch + small tile: exercises row padding, multi-step grid, tail slice.
    key, kx2 = jax.random.split(key)
    B2 = 50
    x2 = jax.random.normal(kx2, (B2, IN_DIM), jnp.float32)
    out2 = jax.block_until_ready(auto_forward(x2, params, batch_tile=16))
    ref2 = auto_forward_ref(x2, params, use_bf16=True)
    assert out2.shape == (B2, IN_DIM)
    assert jnp.allclose(out2, ref2, atol=1e-3, rtol=1e-3), "ragged-batch mismatch"

    # Full-f32 path sanity (weights/activations f32 end to end).
    out3 = jax.block_until_ready(auto_forward(x, params, use_bf16=False))
    assert jnp.allclose(out3, ref_f32, atol=1e-3, rtol=1e-3), "f32-path mismatch"

    print("KERNEL_OK")
</pallas_src>

<mosaic_0001>
module attributes {stable_mosaic.version = 11 : i64} {
  func.func @_auto_kernel(%arg0: i32, %arg1: memref<32x784xbf16, #tpu.memory_space<vmem>>, %arg2: memref<784x128xbf16, #tpu.memory_space<vmem>>, %arg3: memref<1x128xf32, #tpu.memory_space<vmem>>, %arg4: memref<128x64xbf16, #tpu.memory_space<vmem>>, %arg5: memref<1x64xf32, #tpu.memory_space<vmem>>, %arg6: memref<64x12xbf16, #tpu.memory_space<vmem>>, %arg7: memref<1x12xf32, #tpu.memory_space<vmem>>, %arg8: memref<12x3xbf16, #tpu.memory_space<vmem>>, %arg9: memref<1x3xf32, #tpu.memory_space<vmem>>, %arg10: memref<3x12xbf16, #tpu.memory_space<vmem>>, %arg11: memref<1x12xf32, #tpu.memory_space<vmem>>, %arg12: memref<12x64xbf16, #tpu.memory_space<vmem>>, %arg13: memref<1x64xf32, #tpu.memory_space<vmem>>, %arg14: memref<64x128xbf16, #tpu.memory_space<vmem>>, %arg15: memref<1x128xf32, #tpu.memory_space<vmem>>, %arg16: memref<128x784xbf16, #tpu.memory_space<vmem>>, %arg17: memref<1x784xf32, #tpu.memory_space<vmem>>, %arg18: memref<32x784xf32, #tpu.memory_space<vmem>>) attributes {dimension_semantics = [#tpu.dimension_semantics<parallel>], iteration_bounds = array<i64: 2>, scalar_prefetch = 0 : i64, scratch_operands = 0 : i64, tpu.core_type = #tpu.core_type<tc>, window_params = [{transform_indices = @transform_0, window_bounds = array<i64: 32, 784>}, {pipeline_mode = #tpu.pipeline_mode<synchronous>, transform_indices = @transform_1, window_bounds = array<i64: 784, 128>}, {pipeline_mode = #tpu.pipeline_mode<synchronous>, transform_indices = @transform_2, window_bounds = array<i64: 1, 128>}, {pipeline_mode = #tpu.pipeline_mode<synchronous>, transform_indices = @transform_3, window_bounds = array<i64: 128, 64>}, {pipeline_mode = #tpu.pipeline_mode<synchronous>, transform_indices = @transform_4, window_bounds = array<i64: 1, 64>}, {pipeline_mode = #tpu.pipeline_mode<synchronous>, transform_indices = @transform_5, window_bounds = array<i64: 64, 12>}, {pipeline_mode = #tpu.pipeline_mode<synchronous>, transform_indices = @transform_6, window_bounds = array<i64: 1, 12>}, {pipeline_mode = #tpu.pipeline_mode<synchronous>, transform_indices = @transform_7, window_bounds = array<i64: 12, 3>}, {pipeline_mode = #tpu.pipeline_mode<synchronous>, transform_indices = @transform_8, window_bounds = array<i64: 1, 3>}, {pipeline_mode = #tpu.pipeline_mode<synchronous>, transform_indices = @transform_9, window_bounds = array<i64: 3, 12>}, {pipeline_mode = #tpu.pipeline_mode<synchronous>, transform_indices = @transform_10, window_bounds = array<i64: 1, 12>}, {pipeline_mode = #tpu.pipeline_mode<synchronous>, transform_indices = @transform_11, window_bounds = array<i64: 12, 64>}, {pipeline_mode = #tpu.pipeline_mode<synchronous>, transform_indices = @transform_12, window_bounds = array<i64: 1, 64>}, {pipeline_mode = #tpu.pipeline_mode<synchronous>, transform_indices = @transform_13, window_bounds = array<i64: 64, 128>}, {pipeline_mode = #tpu.pipeline_mode<synchronous>, transform_indices = @transform_14, window_bounds = array<i64: 1, 128>}, {pipeline_mode = #tpu.pipeline_mode<synchronous>, transform_indices = @transform_15, window_bounds = array<i64: 128, 784>}, {pipeline_mode = #tpu.pipeline_mode<synchronous>, transform_indices = @transform_16, window_bounds = array<i64: 1, 784>}, {transform_indices = @transform_17, window_bounds = array<i64: 32, 784>}]} {
    %c0 = arith.constant 0 : index
    %c0_0 = arith.constant 0 : index
    %0 = vector.load %arg1[%c0, %c0_0] : memref<32x784xbf16, #tpu.memory_space<vmem>>, vector<32x784xbf16>
    %c0_1 = arith.constant 0 : index
    %c0_2 = arith.constant 0 : index
    %1 = vector.load %arg2[%c0_1, %c0_2] : memref<784x128xbf16, #tpu.memory_space<vmem>>, vector<784x128xbf16>
    %c0_3 = arith.constant 0 : index
    %c0_4 = arith.constant 0 : index
    %2 = vector.load %arg3[%c0_3, %c0_4] : memref<1x128xf32, #tpu.memory_space<vmem>>, vector<1x128xf32>
    %cst = arith.constant dense<0.000000e+00> : vector<32x128xf32>
    %3 = tpu.matmul %0, %1, %cst {dimension_numbers = #tpu.dot_dimension_numbers<[1], [0], [0], [1], [0, 0, 1, 1], [], []>} : vector<32x784xbf16>, vector<784x128xbf16>, vector<32x128xf32> -> vector<32x128xf32>
    %4 = vector.broadcast %2 : vector<1x128xf32> to vector<32x128xf32>
    %5 = arith.addf %3, %4 : vector<32x128xf32>
    %6 = math.tanh %5 : vector<32x128xf32>
    %7 = arith.truncf %6 : vector<32x128xf32> to vector<32x128xbf16>
    %c0_5 = arith.constant 0 : index
    %c0_6 = arith.constant 0 : index
    %8 = vector.load %arg4[%c0_5, %c0_6] : memref<128x64xbf16, #tpu.memory_space<vmem>>, vector<128x64xbf16>
    %c0_7 = arith.constant 0 : index
    %c0_8 = arith.constant 0 : index
    %9 = vector.load %arg5[%c0_7, %c0_8] : memref<1x64xf32, #tpu.memory_space<vmem>>, vector<1x64xf32>
    %cst_9 = arith.constant dense<0.000000e+00> : vector<32x64xf32>
    %10 = tpu.matmul %7, %8, %cst_9 {dimension_numbers = #tpu.dot_dimension_numbers<[1], [0], [0], [1], [0, 0, 1, 1], [], []>} : vector<32x128xbf16>, vector<128x64xbf16>, vector<32x64xf32> -> vector<32x64xf32>
    %11 = vector.broadcast %9 : vector<1x64xf32> to vector<32x64xf32>
    %12 = arith.addf %10, %11 : vector<32x64xf32>
    %13 = math.tanh %12 : vector<32x64xf32>
    %14 = arith.truncf %13 : vector<32x64xf32> to vector<32x64xbf16>
    %c0_10 = arith.constant 0 : index
    %c0_11 = arith.constant 0 : index
    %15 = vector.load %arg6[%c0_10, %c0_11] : memref<64x12xbf16, #tpu.memory_space<vmem>>, vector<64x12xbf16>
    %c0_12 = arith.constant 0 : index
    %c0_13 = arith.constant 0 : index
    %16 = vector.load %arg7[%c0_12, %c0_13] : memref<1x12xf32, #tpu.memory_space<vmem>>, vector<1x12xf32>
    %cst_14 = arith.constant dense<0.000000e+00> : vector<32x12xf32>
    %17 = tpu.matmul %14, %15, %cst_14 {dimension_numbers = #tpu.dot_dimension_numbers<[1], [0], [0], [1], [0, 0, 1, 1], [], []>} : vector<32x64xbf16>, vector<64x12xbf16>, vector<32x12xf32> -> vector<32x12xf32>
    %18 = vector.broadcast %16 : vector<1x12xf32> to vector<32x12xf32>
    %19 = arith.addf %17, %18 : vector<32x12xf32>
    %20 = math.tanh %19 : vector<32x12xf32>
    %21 = arith.truncf %20 : vector<32x12xf32> to vector<32x12xbf16>
    %c0_15 = arith.constant 0 : index
    %c0_16 = arith.constant 0 : index
    %22 = vector.load %arg8[%c0_15, %c0_16] : memref<12x3xbf16, #tpu.memory_space<vmem>>, vector<12x3xbf16>
    %c0_17 = arith.constant 0 : index
    %c0_18 = arith.constant 0 : index
    %23 = vector.load %arg9[%c0_17, %c0_18] : memref<1x3xf32, #tpu.memory_space<vmem>>, vector<1x3xf32>
    %cst_19 = arith.constant dense<0.000000e+00> : vector<32x3xf32>
    %24 = tpu.matmul %21, %22, %cst_19 {dimension_numbers = #tpu.dot_dimension_numbers<[1], [0], [0], [1], [0, 0, 1, 1], [], []>} : vector<32x12xbf16>, vector<12x3xbf16>, vector<32x3xf32> -> vector<32x3xf32>
    %25 = vector.broadcast %23 : vector<1x3xf32> to vector<32x3xf32>
    %26 = arith.addf %24, %25 : vector<32x3xf32>
    %27 = math.tanh %26 : vector<32x3xf32>
    %28 = arith.truncf %27 : vector<32x3xf32> to vector<32x3xbf16>
    %c0_20 = arith.constant 0 : index
    %c0_21 = arith.constant 0 : index
    %29 = vector.load %arg10[%c0_20, %c0_21] : memref<3x12xbf16, #tpu.memory_space<vmem>>, vector<3x12xbf16>
    %c0_22 = arith.constant 0 : index
    %c0_23 = arith.constant 0 : index
    %30 = vector.load %arg11[%c0_22, %c0_23] : memref<1x12xf32, #tpu.memory_space<vmem>>, vector<1x12xf32>
    %cst_24 = arith.constant dense<0.000000e+00> : vector<32x12xf32>
    %31 = tpu.matmul %28, %29, %cst_24 {dimension_numbers = #tpu.dot_dimension_numbers<[1], [0], [0], [1], [0, 0, 1, 1], [], []>} : vector<32x3xbf16>, vector<3x12xbf16>, vector<32x12xf32> -> vector<32x12xf32>
    %32 = vector.broadcast %30 : vector<1x12xf32> to vector<32x12xf32>
    %33 = arith.addf %31, %32 : vector<32x12xf32>
    %34 = math.tanh %33 : vector<32x12xf32>
    %35 = arith.truncf %34 : vector<32x12xf32> to vector<32x12xbf16>
    %c0_25 = arith.constant 0 : index
    %c0_26 = arith.constant 0 : index
    %36 = vector.load %arg12[%c0_25, %c0_26] : memref<12x64xbf16, #tpu.memory_space<vmem>>, vector<12x64xbf16>
    %c0_27 = arith.constant 0 : index
    %c0_28 = arith.constant 0 : index
    %37 = vector.load %arg13[%c0_27, %c0_28] : memref<1x64xf32, #tpu.memory_space<vmem>>, vector<1x64xf32>
    %cst_29 = arith.constant dense<0.000000e+00> : vector<32x64xf32>
    %38 = tpu.matmul %35, %36, %cst_29 {dimension_numbers = #tpu.dot_dimension_numbers<[1], [0], [0], [1], [0, 0, 1, 1], [], []>} : vector<32x12xbf16>, vector<12x64xbf16>, vector<32x64xf32> -> vector<32x64xf32>
    %39 = vector.broadcast %37 : vector<1x64xf32> to vector<32x64xf32>
    %40 = arith.addf %38, %39 : vector<32x64xf32>
    %41 = math.tanh %40 : vector<32x64xf32>
    %42 = arith.truncf %41 : vector<32x64xf32> to vector<32x64xbf16>
    %c0_30 = arith.constant 0 : index
    %c0_31 = arith.constant 0 : index
    %43 = vector.load %arg14[%c0_30, %c0_31] : memref<64x128xbf16, #tpu.memory_space<vmem>>, vector<64x128xbf16>
    %c0_32 = arith.constant 0 : index
    %c0_33 = arith.constant 0 : index
    %44 = vector.load %arg15[%c0_32, %c0_33] : memref<1x128xf32, #tpu.memory_space<vmem>>, vector<1x128xf32>
    %cst_34 = arith.constant dense<0.000000e+00> : vector<32x128xf32>
    %45 = tpu.matmul %42, %43, %cst_34 {dimension_numbers = #tpu.dot_dimension_numbers<[1], [0], [0], [1], [0, 0, 1, 1], [], []>} : vector<32x64xbf16>, vector<64x128xbf16>, vector<32x128xf32> -> vector<32x128xf32>
    %46 = vector.broadcast %44 : vector<1x128xf32> to vector<32x128xf32>
    %47 = arith.addf %45, %46 : vector<32x128xf32>
    %48 = math.tanh %47 : vector<32x128xf32>
    %49 = arith.truncf %48 : vector<32x128xf32> to vector<32x128xbf16>
    %c0_35 = arith.constant 0 : index
    %c0_36 = arith.constant 0 : index
    %50 = vector.load %arg16[%c0_35, %c0_36] : memref<128x784xbf16, #tpu.memory_space<vmem>>, vector<128x784xbf16>
    %c0_37 = arith.constant 0 : index
    %c0_38 = arith.constant 0 : index
    %51 = vector.load %arg17[%c0_37, %c0_38] : memref<1x784xf32, #tpu.memory_space<vmem>>, vector<1x784xf32>
    %cst_39 = arith.constant dense<0.000000e+00> : vector<32x784xf32>
    %52 = tpu.matmul %49, %50, %cst_39 {dimension_numbers = #tpu.dot_dimension_numbers<[1], [0], [0], [1], [0, 0, 1, 1], [], []>} : vector<32x128xbf16>, vector<128x784xbf16>, vector<32x784xf32> -> vector<32x784xf32>
    %53 = vector.broadcast %51 : vector<1x784xf32> to vector<32x784xf32>
    %54 = arith.addf %52, %53 : vector<32x784xf32>
    %c0_40 = arith.constant 0 : index
    %c0_41 = arith.constant 0 : index
    %55 = vector.load %arg18[%c0_40, %c0_41] : memref<32x784xf32, #tpu.memory_space<vmem>>, vector<32x784xf32>
    tpu.vector_store %arg18[%c0_40, %c0_41], %54 {strides = array<i32>} : memref<32x784xf32, #tpu.memory_space<vmem>>, vector<32x784xf32>,
    return
  }
  func.func @transform_0(%arg0: i32) -> (i32, i32) {
    %c0_i32 = arith.constant 0 : i32
    %c0_i32_0 = arith.constant 0 : i32
    return %arg0, %c0_i32 : i32, i32
  }
  func.func @transform_1(%arg0: i32) -> (i32, i32) {
    %c0_i32 = arith.constant 0 : i32
    %c0_i32_0 = arith.constant 0 : i32
    %c0_i32_1 = arith.constant 0 : i32
    return %c0_i32, %c0_i32_0 : i32, i32
  }
  func.func @transform_2(%arg0: i32) -> (i32, i32) {
    %c0_i32 = arith.constant 0 : i32
    %c0_i32_0 = arith.constant 0 : i32
    %c0_i32_1 = arith.constant 0 : i32
    return %c0_i32, %c0_i32_0 : i32, i32
  }
  func.func @transform_3(%arg0: i32) -> (i32, i32) {
    %c0_i32 = arith.constant 0 : i32
    %c0_i32_0 = arith.constant 0 : i32
    %c0_i32_1 = arith.constant 0 : i32
    return %c0_i32, %c0_i32_0 : i32, i32
  }
  func.func @transform_4(%arg0: i32) -> (i32, i32) {
    %c0_i32 = arith.constant 0 : i32
    %c0_i32_0 = arith.constant 0 : i32
    %c0_i32_1 = arith.constant 0 : i32
    return %c0_i32, %c0_i32_0 : i32, i32
  }
  func.func @transform_5(%arg0: i32) -> (i32, i32) {
    %c0_i32 = arith.constant 0 : i32
    %c0_i32_0 = arith.constant 0 : i32
    %c0_i32_1 = arith.constant 0 : i32
    return %c0_i32, %c0_i32_0 : i32, i32
  }
  func.func @transform_6(%arg0: i32) -> (i32, i32) {
    %c0_i32 = arith.constant 0 : i32
    %c0_i32_0 = arith.constant 0 : i32
    %c0_i32_1 = arith.constant 0 : i32
    return %c0_i32, %c0_i32_0 : i32, i32
  }
  func.func @transform_7(%arg0: i32) -> (i32, i32) {
    %c0_i32 = arith.constant 0 : i32
    %c0_i32_0 = arith.constant 0 : i32
    %c0_i32_1 = arith.constant 0 : i32
    return %c0_i32, %c0_i32_0 : i32, i32
  }
  func.func @transform_8(%arg0: i32) -> (i32, i32) {
    %c0_i32 = arith.constant 0 : i32
    %c0_i32_0 = arith.constant 0 : i32
    %c0_i32_1 = arith.constant 0 : i32
    return %c0_i32, %c0_i32_0 : i32, i32
  }
  func.func @transform_9(%arg0: i32) -> (i32, i32) {
    %c0_i32 = arith.constant 0 : i32
    %c0_i32_0 = arith.constant 0 : i32
    %c0_i32_1 = arith.constant 0 : i32
    return %c0_i32, %c0_i32_0 : i32, i32
  }
  func.func @transform_10(%arg0: i32) -> (i32, i32) {
    %c0_i32 = arith.constant 0 : i32
    %c0_i32_0 = arith.constant 0 : i32
    %c0_i32_1 = arith.constant 0 : i32
    return %c0_i32, %c0_i32_0 : i32, i32
  }
  func.func @transform_11(%arg0: i32) -> (i32, i32) {
    %c0_i32 = arith.constant 0 : i32
    %c0_i32_0 = arith.constant 0 : i32
    %c0_i32_1 = arith.constant 0 : i32
    return %c0_i32, %c0_i32_0 : i32, i32
  }
  func.func @transform_12(%arg0: i32) -> (i32, i32) {
    %c0_i32 = arith.constant 0 : i32
    %c0_i32_0 = arith.constant 0 : i32
    %c0_i32_1 = arith.constant 0 : i32
    return %c0_i32, %c0_i32_0 : i32, i32
  }
  func.func @transform_13(%arg0: i32) -> (i32, i32) {
    %c0_i32 = arith.constant 0 : i32
    %c0_i32_0 = arith.constant 0 : i32
    %c0_i32_1 = arith.constant 0 : i32
    return %c0_i32, %c0_i32_0 : i32, i32
  }
  func.func @transform_14(%arg0: i32) -> (i32, i32) {
    %c0_i32 = arith.constant 0 : i32
    %c0_i32_0 = arith.constant 0 : i32
    %c0_i32_1 = arith.constant 0 : i32
    return %c0_i32, %c0_i32_0 : i32, i32
  }
  func.func @transform_15(%arg0: i32) -> (i32, i32) {
    %c0_i32 = arith.constant 0 : i32
    %c0_i32_0 = arith.constant 0 : i32
    %c0_i32_1 = arith.constant 0 : i32
    return %c0_i32, %c0_i32_0 : i32, i32
  }
  func.func @transform_16(%arg0: i32) -> (i32, i32) {
    %c0_i32 = arith.constant 0 : i32
    %c0_i32_0 = arith.constant 0 : i32
    %c0_i32_1 = arith.constant 0 : i32
    return %c0_i32, %c0_i32_0 : i32, i32
  }
  func.func @transform_17(%arg0: i32) -> (i32, i32) {
    %c0_i32 = arith.constant 0 : i32
    %c0_i32_0 = arith.constant 0 : i32
    return %arg0, %c0_i32 : i32, i32
  }
}

</mosaic_0001>

<bundles_post_ra>
// kernel: tpu_custom_call.1
= control target key start
LH: loop header
LB: loop body
LE: loop exit
PB: predicated region body
PF: predicated region fallthrough
CT: control target
= control target key end

     0   :  { %s3913_s0 = inlined_call_operand.vmem [shape: bf16[64,784], index: 0, kind: input, shape index: {}]   ;;  %s3914_s1 = inlined_call_operand.vmem [shape: bf16[784,128], index: 1, kind: input, shape index: {}]   ;;  %s3915_s2 = inlined_call_operand.vmem [shape: f32[1,128], index: 2, kind: input, shape index: {}]   ;;  %s3916_s3 = inlined_call_operand.vmem [shape: bf16[128,64], index: 3, kind: input, shape index: {}]   ;;  %s3917_s4 = inlined_call_operand.vmem [shape: f32[1,64], index: 4, kind: input, shape index: {}]   ;;  %s3918_s5 = inlined_call_operand.vmem [shape: bf16[64,12], index: 5, kind: input, shape index: {}]   ;;  %s3919_s6 = inlined_call_operand.vmem [shape: f32[1,12], index: 6, kind: input, shape index: {}]   ;;  %s3920_s7 = inlined_call_operand.vmem [shape: bf16[12,3], index: 7, kind: input, shape index: {}]   ;;  %s3921_s8 = inlined_call_operand.vmem [shape: f32[1,3], index: 8, kind: input, shape index: {}]   ;;  %s3922_s9 = inlined_call_operand.vmem [shape: bf16[3,12], index: 9, kind: input, shape index: {}]   ;;  %s3923_s10 = inlined_call_operand.vmem [shape: f32[1,12], index: 10, kind: input, shape index: {}]   ;;  %s3924_s11 = inlined_call_operand.vmem [shape: bf16[12,64], index: 11, kind: input, shape index: {}]   ;;  %s3925_s12 = inlined_call_operand.vmem [shape: f32[1,64], index: 12, kind: input, shape index: {}]   ;;  %s3926_s13 = inlined_call_operand.vmem [shape: bf16[64,128], index: 13, kind: input, shape index: {}]   ;;  %s3927_s14 = inlined_call_operand.vmem [shape: f32[1,128], index: 14, kind: input, shape index: {}]   ;;  %s3928_s15 = inlined_call_operand.vmem [shape: bf16[128,784], index: 15, kind: input, shape index: {}]   ;;  %s3929_s16 = inlined_call_operand.vmem [shape: f32[1,784], index: 16, kind: input, shape index: {}]   ;;  %s3930_s17 = inlined_call_operand.hbm [shape: f32[64,784], index: 17, kind: output, shape index: {}]  }
   0x1   :  { %3939 = sst [smem:[#allocation11_spill]] %s3913_s0 }
   0x2   :  { %3940 = sst [smem:[#allocation12_spill]] %s3914_s1 }
   0x3   :  { %3941 = sst [smem:[#allocation13_spill]] %s3930_s17 }
   0x4   :  { %22 = vsyncpa [#allocation3], 0 }
   0x5   :  { %24 = vsyncpa [#allocation3 + $0x1], 0  ;;  %s3325_s24 = smov 0   ;;  %s3327_s25 = smov 0  }
   0x6   :  { %s3329_s26 = smov 0   ;;  %s3331_s27 = smov 0  }
   0x7 LB: > { %3942 = sst [smem:[#allocation5_spill]] %s3216_s24  ;;  %s3346_s28 = sadd.s32 4294967295, %s3228_s27   ;;  %s3228_s27 = sphi %s3331_s27, %s3957_s27   ;;  %s3224_s26 = sphi %s3329_s26, %s3959_s26   ;;  %s3220_s25 = sphi %s3327_s25, %s3961_s25   ;;  %s3216_s24 = sphi %s3325_s24, %s3960_s24  }
   0x8   : > { %3943 = sst [smem:[#allocation6_spill]] %s3224_s26  ;;  %s2512_s29 = sadd.s32 4294967294, %s3228_s27  }
   0x9   : > { %3944 = sst [smem:[#allocation7_spill]] %s3228_s27  ;;  %s3350_s0 = sadd.s32 1, %s3228_s27  }
   0xa   : > { %3945 = sst [smem:[#allocation8_spill]] %s3350_s0  ;;  %s399_s30 = sadd.s32 1, %s3224_s26 }
   0xb   : > { %s396_s18 = ssub.s32 %s3228_s27, %s3350_s0  ;;  %p409_p0 = scmp.ne.s32.totalorder %s3224_s26, %s3220_s25 }
   0xc   : > { %p397_p1 = scmp.eq.s32.totalorder %s396_s18, 0  ;;  %p410_p2 = scmp.eq.s32.totalorder %s3346_s28, 1 }
   0xd   : > { %p415_p3 = scmp.ne.s32.totalorder %s3220_s25, %s3216_s24  ;;  %p416_p4 = scmp.eq.s32.totalorder %s2512_s29, 1 }
   0xe   : > { %s3361_s19 = scalar_select %p397_p1, %s3224_s26, %s399_s30  }
   0xf   : > { %p3363_p5 = por %p410_p2, %p409_p0  ;;  %p3367_p6 = por %p416_p4, %p415_p3 }
  0x10   : > { %3946 = sst [smem:[#allocation9_spill]] %s3361_s19  ;;  %p2515_p7 = scmp.ge.s32.totalorder %s3228_s27, 1 }
  0x11   : > { %s3948_s20 = scalar_select %p3367_p6, 1, 0 }
  0x12   : > { %p492_p8 = scmp.lt.s32.totalorder %s3228_s27, 3 }
  0x13   : > { %3949 = sst [smem:[#allocation10_spill]] %s3948_s20 }
  0x14   : > { %p493_p9 = pnand %p2515_p7, %p492_p8 }
  0x15   : > { %s3950_s23 = sld [smem:[#allocation12_spill]] (!%p493_p9)  ;;  %s2516_s20 = sshll.u32 (!%p493_p9), %s3346_s28, 2  ;;  %vm1039_vm0 = vcmask (!%p493_p9), 130048   ;;  %v3012_v63 = vld [vmem:[%s3916_s3] sm:$0xff] (!%p493_p9)   ;;  %vm1413_vm1 = vcmask (!%p493_p9), 523264   ;;  %vm1496_vm2 = vcmask (!%p493_p9), 1045504  }
  0x16   : > { %496 = sbr.rel (%p493_p9) target bundleno = 1991 (0x7c7), region = 88  ;;  %p546_p10 = scmp.lt.s32.totalorder (!%p493_p9), %s2516_s20, 7  ;;  %vm1489_vm3 = vcmask (!%p493_p9), 97280   ;;  %vm1570_vm4 = vcmask (!%p493_p9), 1040384   ;;  %vm1571_vm5 = vcmask (!%p493_p9), 1041408   ;;  %vm1563_vm6 = vcmask (!%p493_p9), 23552  }
  0x17   : > { %s3951_s17 = sld [smem:[#allocation11_spill]] (!%p493_p9)  ;;  %s542_s24 = sand.u32 (!%p493_p9), 1, %s3220_s25  }
  0x18   : > { %s2897_s30 = smul.u32 (!%p493_p9), 224, %s542_s24  ;;  %s3952_s26 = sld [smem:[#allocation13_spill]] (!%p493_p9) }
  0x19   : > { %s2899_s22 = smul.u32 (!%p493_p9), 3584, %s3346_s28  ;;  %s3872_s28 = scalar_lea.sflag (!%p493_p9), [#allocation3], %s542_s24 }
  0x1a   : > { %s3824_s21 = scalar_lea.vmem (!%p493_p9), [#allocation2], %s2897_s30 }
  0x1b   : > { %v2943_v0 = vld [vmem:[%s3950_s23 + $0x40] sm:$0xff] (!%p493_p9)   ;;  %v2947_v4 = vld [vmem:[%s3950_s23 + $0x48] sm:$0xff] (!%p493_p9)   ;;  %v2951_v8 = vld [vmem:[%s3950_s23 + $0x50] sm:$0xff] (!%p493_p9)  }
  0x1c   : > { %v2944_v1 = vld [vmem:[%s3950_s23] sm:$0xff] (!%p493_p9)   ;;  %2679 = vmatprep.subr.bf16.mxu0 (!%p493_p9), %v2943_v0  ;;  %v2948_v5 = vld [vmem:[%s3950_s23 + $0x8] sm:$0xff] (!%p493_p9)   ;;  %v2952_v9 = vld [vmem:[%s3950_s23 + $0x10] sm:$0xff] (!%p493_p9)  }
  0x1d   : > { %v2945_v2 = vld [vmem:[%s3950_s23 + $0xc0] sm:$0xff]   ;;  %2680 = vmatpush3.bf16.msra.mxu0 %v2944_v1  ;;  %v2949_v6 = vld [vmem:[%s3950_s23 + $0xc8] sm:$0xff]   ;;  %v2953_v10 = vld [vmem:[%s3950_s23 + $0xd0] sm:$0xff]   ;;  %s3963_s20 = smov (!%p546_p10, %s2516_s20), 7 }
  0x1e   : > { %v2946_v3 = vld [vmem:[%s3950_s23 + $0x80] sm:$0xff]   ;;  %2707 = vmatprep.subr.bf16.mxu1 %v2945_v2  ;;  %2681 = vmatprep.subr.bf16.mxu0 %v2947_v4  ;;  %v2950_v7 = vld [vmem:[%s3950_s23 + $0x88] sm:$0xff]   ;;  %v2954_v11 = vld [vmem:[%s3950_s23 + $0x90] sm:$0xff]   ;;  %s2898_s29 = smul.u32 28, %s3963_s20  ;;  %s2450_s20 = sshll.u32 %s3824_s21, 4  ;;  %s3865_s20 = int_to_ptr.vmem [resolvable:$true] %s2450_s20 }
  0x1f   : > { %2708 = vmatpush3.bf16.msra.mxu1 %v2946_v3  ;;  %v2955_v12 = vld [vmem:[%s3950_s23 + $0x58] sm:$0xff]   ;;  %v2959_v16 = vld [vmem:[%s3950_s23 + $0x60] sm:$0xff]   ;;  %v2963_v20 = vld [vmem:[%s3950_s23 + $0x68] sm:$0xff]   ;;  %s3953_s0 = smov %s3952_s26 }
  0x20   : > { %2709 = vmatprep.subr.bf16.mxu1 %v2949_v6  ;;  %v2956_v13 = vld [vmem:[%s3950_s23 + $0x18] sm:$0xff]   ;;  %v2960_v17 = vld [vmem:[%s3950_s23 + $0x20] sm:$0xff]   ;;  %v2964_v21 = vld [vmem:[%s3950_s23 + $0x28] sm:$0xff]   ;;  %s3464_s27 = scalar_lea.vmem %s3951_s17, %s2898_s29  ;;  %s3166_s17 = scalar_lea.vmem %s3865_s20, 3584 }
  0x21   : > { %2682 = vmatpush3.bf16.msra.mxu0 %v2948_v5  ;;  %v2957_v14 = vld [vmem:[%s3950_s23 + $0xd8] sm:$0xff]   ;;  %v2961_v18 = vld [vmem:[%s3950_s23 + $0xe0] sm:$0xff]   ;;  %v2965_v22 = vld [vmem:[%s3950_s23 + $0xe8] sm:$0xff]   ;;  %p3167_p11 = scmp.ne.s32.totalorder %s3865_s20, %s3166_s17  ;;  %s3232_s29 = smov [#allocation2]  }
  0x22   : > { %2683 = vmatprep.subr.bf16.mxu0 %v2951_v8  ;;  %v2958_v15 = vld [vmem:[%s3950_s23 + $0x98] sm:$0xff]   ;;  %v2962_v19 = vld [vmem:[%s3950_s23 + $0xa0] sm:$0xff]   ;;  %v2966_v23 = vld [vmem:[%s3950_s23 + $0xa8] sm:$0xff]   ;;  %s3170_s30 = sshll.u32 %s3232_s29, 4  ;;  %s3171_s30 = int_to_ptr.vmem [resolvable:$false] %s3170_s30 }
  0x23   : > { %2710 = vmatpush3.bf16.msra.mxu1 %v2950_v7  ;;  %v2967_v24 = vld [vmem:[%s3950_s23 + $0x70] sm:$0xff]   ;;  %v2971_v28 = vld [vmem:[%s3950_s23 + $0x78] sm:$0xff]   ;;  %v2976_v32 = vld [vmem:[%s3464_s27 + $0x4] ss:$28 sps:$4 sm:$0xff]   ;;  %p3168_p12 = pnand %p3167_p11, %p3363_p5  ;;  %p3173_p0 = scmp.lt.s32.totalorder %s3865_s20, %s3171_s30 }
  0x24   : > { %2711 = vmatprep.subr.bf16.mxu1 %v2953_v10  ;;  %v2968_v25 = vld [vmem:[%s3950_s23 + $0x30] sm:$0xff]   ;;  %v2972_v29 = vld [vmem:[%s3950_s23 + $0x38] sm:$0xff]   ;;  %1078 = vmatprep.mubr.bf16.mxu0 %v2976_v32  ;;  %v2978_v34 = vld [vmem:[%s3950_s23 + $0x140] sm:$0xff]  }
  0x25   : > { %2684 = vmatpush3.bf16.msra.mxu0 %v2952_v9  ;;  %v2969_v26 = vld [vmem:[%s3950_s23 + $0xf0] sm:$0xff]   ;;  %v2973_v30 = vld [vmem:[%s3950_s23 + $0xf8] sm:$0xff]   ;;  %v2979_v35 = vld [vmem:[%s3464_s27 + $0x8] ss:$28 sps:$4 sm:$0xff]   ;;  %p3169_p13 = pneg %p3168_p12 }
  0x26   : > { %2685 = vmatprep.subr.bf16.mxu0 %v2955_v12  ;;  %v2970_v27 = vld [vmem:[%s3950_s23 + $0xb0] sm:$0xff]   ;;  %v2974_v31 = vld [vmem:[%s3464_s27] ss:$28 sps:$4 sm:$0xff]   ;;  %v2981_v36 = vld [vmem:[%s3464_s27 + $0xc] ss:$28 sps:$4 sm:$0xff]  }
  0x27   : > { %2712 = vmatpush3.bf16.msra.mxu1 %v2954_v11  ;;  %v2977_v33 = vld [vmem:[%s3950_s23 + $0xb8] sm:$0xff]   ;;  %v2982_v37 = vld [vmem:[%s3950_s23 + $0x100] sm:$0xff]   ;;  %1127 = vmatprep.mubr.bf16.mxu1 %v2981_v36  ;;  %v2983_v38 = vld [vmem:[%s3950_s23 + $0x148] sm:$0xff]  }
  0x28   : > { %2713 = vmatprep.subr.bf16.mxu1 %v2957_v14  ;;  %v2984_v39 = vld [vmem:[%s3950_s23 + $0x108] sm:$0xff]   ;;  %v2985_v40 = vld [vmem:[%s3950_s23 + $0x150] sm:$0xff]   ;;  %v2987_v42 = vld [vmem:[%s3950_s23 + $0x158] sm:$0xff]  }
  0x29   : > { %2686 = vmatpush3.bf16.msra.mxu0 %v2956_v13  ;;  %v2986_v41 = vld [vmem:[%s3950_s23 + $0x110] sm:$0xff]   ;;  %v2991_v43 = vld [vmem:[%s3464_s27 + $0x3c] ss:$28 sps:$4 sm:$0xff]   ;;  %v2989_v46 = vld [vmem:[%s3950_s23 + $0x160] sm:$0xff]  }
  0x2a   : > { %2687 = vmatprep.subr.bf16.mxu0 %v2959_v16  ;;  %v2988_v44 = vld [vmem:[%s3950_s23 + $0x118] sm:$0xff]   ;;  %v2996_v47 = vld [vmem:[%s3464_s27 + $0x44] ss:$28 sps:$4 sm:$0xff]   ;;  %v2993_v50 = vld [vmem:[%s3950_s23 + $0x168] sm:$0xff]  }
  0x2b   : > { %2714 = vmatpush3.bf16.msra.mxu1 %v2958_v15  ;;  %v2994_v45 = vld [vmem:[%s3464_s27 + $0x38] ss:$28 sps:$4 sm:$0xff]   ;;  %v2998_v48 = vld [vmem:[%s3464_s27 + $0x40] ss:$28 sps:$4 sm:$0xff]   ;;  %v2995_v52 = vld [vmem:[%s3950_s23 + $0x128] sm:$0xff]  }
  0x2c   : > { %2715 = vmatprep.subr.bf16.mxu1 %v2961_v18  ;;  %v2990_v49 = vld [vmem:[%s3950_s23 + $0x120] sm:$0xff]   ;;  %v2999_v53 = vld [vmem:[%s3950_s23 + $0x170] sm:$0xff]   ;;  %v3002_v58 = vld [vmem:[%s3950_s23 + $0x178] sm:$0xff]  }
  0x2d   : > { %2688 = vmatpush3.bf16.msra.mxu0 %v2960_v17  ;;  %v3001_v51 = vld [vmem:[%s3950_s23 + $0x180] sm:$0xff]   ;;  %v3006_v54 = vld [vmem:[%s3464_s27 + $0x14] ss:$28 sps:$4 sm:$0xff]   ;;  %v3003_v59 = vld [vmem:[%s3950_s23 + $0x138] sm:$0xff]  }
  0x2e   : > { %2689 = vmatprep.subr.bf16.mxu0 %v2963_v20  ;;  %v3007_v55 = vld [vmem:[%s3464_s27 + $0x18] ss:$28 sps:$4 sm:$0xff]   ;;  %v3008_v56 = vld [vmem:[%s3464_s27 + $0x50] ss:$28 sps:$4 sm:$0xff]   ;;  %v3011_v62 = vld [vmem:[%s3464_s27 + $0x48] ss:$28 sps:$4 sm:$0xff]  }
  0x2f   : > { %2716 = vmatpush3.bf16.msra.mxu1 %v2962_v19  ;;  %v3000_v57 = vld [vmem:[%s3950_s23 + $0x130] sm:$0xff]   ;;  %v3009_v61 = vld [vmem:[%s3464_s27 + $0x4c] ss:$28 sps:$4 sm:$0xff]   ;;  %v3015_v2 = vld [vmem:[%s3916_s3 + $0x18] sm:$0xff]  }
  0x30   : > { %2717 = vmatprep.subr.bf16.mxu1 %v2965_v22  ;;  %v3004_v60 = vld [vmem:[%s3464_s27 + $0x10] ss:$28 sps:$4 sm:$0xff]   ;;  %v3016_v3 = vld [vmem:[%s3916_s3 + $0x20] sm:$0xff]   ;;  %v3019_v6 = vld [vmem:[%s3916_s3 + $0x38] sm:$0xff]   ;;  %s3863_s27 = scalar_lea.hbm %s3952_s26, %s2899_s22  ;;  %s3172_s22 = scalar_lea.vmem %s3171_s30, 7168 }
  0x31   : > { %2690 = vmatpush3.bf16.msra.mxu0 %v2964_v21  ;;  %v3013_v0 = vld [vmem:[%s3916_s3 + $0x8] sm:$0xff]   ;;  %v3014_v1 = vld [vmem:[%s3916_s3 + $0x10] sm:$0xff]   ;;  %v2518_v8 = vld [vmem:[%s3915_s2] ss:$0 sm:$0xff]  ;;  %p3174_p1 = scmp.lt.s32.totalorder %s3172_s22, %s3166_s17 }
  0x32   : > { %2691 = vmatprep.subr.bf16.mxu0 %v2967_v24  ;;  %v3017_v4 = vld [vmem:[%s3916_s3 + $0x28] sm:$0xff]   ;;  %v3018_v5 = vld [vmem:[%s3916_s3 + $0x30] sm:$0xff]  }
  0x33   : > { %2718 = vmatpush3.bf16.msra.mxu1 %v2966_v23  ;;  %p3175_p2 = por %p3174_p1, %p3173_p0 }
  0x34   : > { %2719 = vmatprep.subr.bf16.mxu1 %v2969_v26 }
  0x35   : > { %2692 = vmatpush3.bf16.msra.mxu0 %v2968_v25  ;;  %p3176_p3 = pnand %p3175_p2, %p3169_p13 }
  0x36   : > { %2693 = vmatprep.subr.bf16.mxu0 %v2971_v28 }
  0x37   : > { %2720 = vmatpush3.bf16.msra.mxu1 %v2970_v27 }
  0x38   : > { %2721 = vmatprep.subr.bf16.mxu1 %v2973_v30 }
  0x39   : > { %2694 = vmatpush3.bf16.msra.mxu0 %v2972_v29 }
  0x3a   : > { %2735 = vmatprep.subr.bf16.mxu0 %v2978_v34 }
  0x3b   : > { %2722 = vmatpush3.bf16.msra.mxu1 %v2977_v33 }
  0x3c   : > { %1079 = vmatmul.mubr.bf16.vlgmr.msra.gmra.mrb[0].mxu0 %v2974_v31  ;;  %2807 = vmatprep.subr.bf16.mxu1 %v3001_v51 }
  0x3d   : > { %2736 = vmatpush3.bf16.msra.mxu0 %v2982_v37  ;;  %1086 = vmatprep.mubr.bf16.mxu0 %v2991_v43 }
  0x3e   : > { %1128 = vmatmul.mubr.bf16.vlgmr.msra.gmra.mrb[0].mxu1 %v2979_v35  ;;  %2737 = vmatprep.subr.bf16.mxu0 %v2983_v38 }
  0x3f   : > { %1135 = vmatprep.mubr.bf16.mxu1 %v2996_v47  ;;  %2808 = vmatpush3.bf16.msra.mxu1 %v3001_v51 }
  0x40   : > { %2813 = vmatprep.subr.bf16.mxu1 %v3012_v63 }
  0x41   : > { %2738 = vmatpush3.bf16.msra.mxu0 %v2984_v39 }
  0x42   : > { %2739 = vmatprep.subr.bf16.mxu0 %v2985_v40 }
  0x44   : > { %1087 = vmatmul.mubr.bf16.gmra.mrb[4].mxu0 %v2994_v45 }
  0x45   : > { %2740 = vmatpush3.bf16.msra.mxu0 %v2986_v41  ;;  %1176 = vmatprep.mubr.bf16.mxu0 %v3006_v54 }
  0x46   : > { %2741 = vmatprep.subr.bf16.mxu0 %v2987_v42  ;;  %1136 = vmatmul.mubr.bf16.gmra.mrb[4].mxu1 %v2998_v48 }
  0x47   : > { %2809 = vmatprep.mubr.msk.bf16.mxu1 %vm1039_vm0, %v3007_v55 }
  0x49   : > { %2742 = vmatpush3.bf16.msra.mxu0 %v2988_v44 }
  0x4a   : > { %2743 = vmatprep.subr.bf16.mxu0 %v2989_v46 }
  0x4d   : > { %2744 = vmatpush3.bf16.msra.mxu0 %v2990_v49 }
  0x4e   : > { %2745 = vmatprep.subr.bf16.mxu0 %v2993_v50  ;;  %2810 = vmatmul.mubr.msk.bf16.vlgmr.msra.gmra.mrb[8].mxu1 %vm1039_vm0, %v3008_v56 }
  0x4f   : > { %2814 = vmatpush3.bf16.msra.mxu1 %v3012_v63 }
  0x50   : > { %2815 = vmatprep.subr.bf16.mxu1 %v3013_v0 }
  0x51   : > { %2746 = vmatpush3.bf16.msra.mxu0 %v2995_v52 }
  0x52   : > { %2747 = vmatprep.subr.bf16.mxu0 %v2999_v53 }
  0x53   : > { %2816 = vmatpush3.bf16.msra.mxu1 %v3013_v0 }
  0x54   : > { %2817 = vmatprep.subr.bf16.mxu1 %v3014_v1 }
  0x55   : > { %2748 = vmatpush3.bf16.msra.mxu0 %v3000_v57 }
  0x56   : > { %2749 = vmatprep.subr.bf16.mxu0 %v3002_v58 }
  0x57   : > { %2818 = vmatpush3.bf16.msra.mxu1 %v3014_v1 }
  0x58   : > { %2819 = vmatprep.subr.bf16.mxu1 %v3015_v2 }
  0x59   : > { %2750 = vmatpush3.bf16.msra.mxu0 %v3003_v59 }
  0x5b   : > { %2820 = vmatpush3.bf16.msra.mxu1 %v3015_v2 }
  0x5c   : > { %1177 = vmatmul.mubr.bf16.vlgmr.msra.gmra.mrb[8].mxu0 %v3004_v60  ;;  %2821 = vmatprep.subr.bf16.mxu1 %v3016_v3 }
  0x5d   : > { %1184 = vmatprep.mubr.bf16.mxu0 %v3009_v61 }
  0x5f   : > { %2822 = vmatpush3.bf16.msra.mxu1 %v3016_v3 }
  0x60   : > { %2823 = vmatprep.subr.bf16.mxu1 %v3017_v4 }
  0x63   : > { %2824 = vmatpush3.bf16.msra.mxu1 %v3017_v4 }
  0x64   : > { %1185 = vmatmul.mubr.bf16.gmra.mrb[12].mxu0 %v3011_v62  ;;  %2825 = vmatprep.subr.bf16.mxu1 %v3018_v5 }
  0x67   : > { %2826 = vmatpush3.bf16.msra.mxu1 %v3018_v5 }
  0x68   : > { %2827 = vmatprep.subr.bf16.mxu1 %v3019_v6 }
  0x6b   : > { %2828 = vmatpush3.bf16.msra.mxu1 %v3019_v6  ;;  %v3020_v6 = vld [vmem:[%s3918_s5] sm:$0xff]  }
  0x6c   : > { %2833 = vmatprep.subr.bf16.mxu0 %v3020_v6 }
  0x6d   : > { %2834 = vmatpush3.bf16.msra.mxu0 %v3020_v6 }
 0x10f   : > { %v2695_v7 = vpop.f32.mrb[0].mxu0 }
 0x110   : > { %v2696_v9 = vpop.f32.mrb[1].mxu0 }
 0x111   : > { %v2697_v10 = vadd.f32 %v2696_v9, %v2695_v7  ;;  %v2698_v11 = vpop.f32.mrb[2].mxu0  ;;  %v2723_v12 = vpop.f32.mrb[0].mxu1  ;;  %v3021_v7 = vld [vmem:[%s3918_s5 + $0x8] sm:$0xff]   ;;  %v3023_v9 = vld [vmem:[%s3918_s5 + $0x18] sm:$0xff]  }
 0x112   : > { %v2699_v13 = vpop.f32.mrb[3].mxu0  ;;  %v2724_v16 = vpop.f32.mrb[1].mxu1  ;;  %2835 = vmatprep.subr.bf16.mxu0 %v3021_v7 }
 0x113   : > { %v1081_v14 = vadd.f32 %v2697_v10, %v2518_v8  ;;  %v2700_v15 = vadd.f32 %v2699_v13, %v2698_v11  ;;  %v2725_v17 = vadd.f32 %v2724_v16, %v2723_v12  ;;  %v2726_v18 = vpop.f32.mrb[2].mxu1  ;;  %2836 = vmatpush3.bf16.msra.mxu0 %v3021_v7  ;;  %v2584_v10 = vld [vmem:[%s3917_s4] ss:$0 sm:$0xff] }
 0x114   : > { %v2727_v20 = vpop.f32.mrb[3].mxu1 }
 0x115   : > { %v1084_v19 = vadd.f32 %v2700_v15, %v2518_v8  ;;  %v1130_v21 = vadd.f32 %v2725_v17, %v1081_v14  ;;  %v2728_v22 = vadd.f32 %v2727_v20, %v2726_v18 }
 0x117   : > { %v1133_v23 = vadd.f32 %v2728_v22, %v1084_v19  ;;  %v2701_v24 = vpop.f32.mrb[4].mxu0 }
 0x118   : > { %v2702_v25 = vpop.f32.mrb[5].mxu0 }
 0x119   : > { %v2703_v26 = vadd.f32 %v2702_v25, %v2701_v24  ;;  %v2704_v27 = vpop.f32.mrb[6].mxu0  ;;  %v2729_v28 = vpop.f32.mrb[4].mxu1  ;;  %v3024_v25 = vld [vmem:[%s3920_s7] sm:$0x3f]  }
 0x11a   : > { %v2705_v29 = vpop.f32.mrb[7].mxu0  ;;  %v2730_v32 = vpop.f32.mrb[5].mxu1 }
 0x11b   : > { %v1089_v30 = vadd.f32 %v2703_v26, %v2518_v8  ;;  %v2706_v31 = vadd.f32 %v2705_v29, %v2704_v27  ;;  %v2731_v33 = vadd.f32 %v2730_v32, %v2729_v28  ;;  %v2732_v34 = vpop.f32.mrb[6].mxu1  ;;  %v1498_v26 = vsel %vm1496_vm2, %v3024_v25, 0  ;;  %v2593_v27 = vld [vmem:[%s3919_s6] ss:$0 sm:$0xff] }
 0x11c   : > { %v2733_v36 = vpop.f32.mrb[7].mxu1 }
 0x11d   : > { %v1092_v35 = vadd.f32 %v2706_v31, %v2518_v8  ;;  %v1138_v37 = vadd.f32 %v2731_v33, %v1089_v30  ;;  %v2734_v38 = vadd.f32 %v2733_v36, %v2732_v34  ;;  %v3022_v8 = vld [vmem:[%s3918_s5 + $0x10] sm:$0xff]  }
 0x11e   : > { %2837 = vmatprep.subr.bf16.mxu0 %v3022_v8 }
 0x11f   : > { %v1141_v39 = vadd.f32 %v2734_v38, %v1092_v35  ;;  %2838 = vmatpush3.bf16.msra.mxu0 %v3022_v8 }
 0x120   : > { %2839 = vmatprep.subr.bf16.mxu0 %v3023_v9 }
 0x121   : > { %v2811_v40 = vpop.f32.mrb[8].mxu1 }
 0x122   : > { %v1227_v41 = vpop.f32.mrb[9].mxu1 }
 0x123   : > { %v2812_v42 = vpop.f32.mrb[10].mxu1  ;;  %2840 = vmatpush3.bf16.msra.mxu0 %v3023_v9 }
 0x124   : > { %v1230_v43 = vpop.f32.mrb[11].mxu1  ;;  %2895 = vmatprep.subr.msk.bf16.mxu0 %vm1496_vm2, %v3024_v25  ;;  %v3042_v25 = vld [vmem:[%s3928_s15 + $0x70] ss:$28 sps:$4 sm:$0xff]  }
 0x12f   : > { %v2751_v44 = vpop.f32.mrb[8].mxu0 }
 0x130   : > { %v2752_v45 = vpop.f32.mrb[9].mxu0 }
 0x131   : > { %v2753_v46 = vadd.f32 %v2752_v45, %v2751_v44  ;;  %v2754_v47 = vpop.f32.mrb[10].mxu0 }
 0x132   : > { %v2755_v48 = vpop.f32.mrb[11].mxu0 }
 0x133   : > { %v2756_v49 = vadd.f32 %v2755_v48, %v2754_v47  ;;  %v1179_v50 = vadd.f32 %v2753_v46, %v1130_v21  ;;  %v2600_v47 = vld [vmem:[%s3921_s8] ss:$0 sm:$0xff] }
 0x135   : > { %v1228_v51 = vadd.f32 %v1227_v41, %v1179_v50  ;;  %v1182_v52 = vadd.f32 %v2756_v49, %v1133_v23 }
 0x137   : > { %v1231_v53 = vadd.f32 %v1230_v43, %v1182_v52  ;;  %v2757_v54 = vpop.f32.mrb[12].mxu0  ;;  %3110 = vtanh.f32 %v1228_v51  ;;  %v3230_v43 = vmov 65535  }
 0x138   : > { %v2758_v55 = vpop.f32.mrb[13].mxu0  ;;  %v1572_v44 = vsel %vm1570_vm4, 4294967295, %v3230_v43  ;;  %v3033_v43 = vld [vmem:[%s3928_s15 + $0x8] ss:$28 sps:$4 sm:$0xff]  }
 0x139   : > { %3112 = vtanh.f32 %v1231_v53  ;;  %v2759_v56 = vadd.f32 %v2758_v55, %v2757_v54  ;;  %v2760_v57 = vpop.f32.mrb[14].mxu0  ;;  %v1573_v45 = vsel %vm1571_vm5, %v1572_v44, 0  ;;  %v3041_v44 = vld [vmem:[%s3928_s15 + $0x44] ss:$28 sps:$4 sm:$0xff]  }
 0x13a   : > { %v2761_v58 = vpop.f32.mrb[15].mxu0 }
 0x13b   : > { %v1187_v59 = vadd.f32 %v2759_v56, %v1138_v37  ;;  %v2762_v60 = vadd.f32 %v2761_v58, %v2760_v57 }
 0x13d   : > { %v1236_v61 = vadd.f32 %v2811_v40, %v1187_v59  ;;  %v1190_v62 = vadd.f32 %v2762_v60, %v1141_v39 }
 0x13f   : > { %v1239_v63 = vadd.f32 %v2812_v42, %v1190_v62  ;;  %3114 = vtanh.f32 %v1236_v61  ;;  %v1555_v42 = vld [vmem:[%s3922_s9] sm:$0x3] }
 0x140   : > { %v1575_v46 = vand.u32 %v1573_v45, %v1555_v42  ;;  %v3025_v62 = vld [vmem:[%s3924_s11] sm:$0x3f]  }
 0x141   : > { %3116 = vtanh.f32 %v1239_v63  ;;  %v3111_v0 = vpop.eup %3110  ;;  %v1653_v63 = vsel %vm1496_vm2, %v3025_v62, 0  ;;  %v3039_v45 = vld [vmem:[%s3928_s15 + $0x40] ss:$28 sps:$4 sm:$0xff]  }
 0x142   : > { %2851 = vmatprep.subr.bf16.mxu1 %v1575_v46 }
 0x143   : > { %v3113_v1 = vpop.eup %3112 }
 0x144   : > { %v1246_v2 = vpack.c.bf16 %v3113_v1, %v3111_v0  ;;  %v2604_v0 = vld [vmem:[%s3923_s10] ss:$0 sm:$0xff] }
 0x146   : > { %2829 = vmatprep.mubr.bf16.mxu1 %v1246_v2 }
 0x149   : > { %v3115_v3 = vpop.eup %3114 }
 0x14b   : > { %v3117_v4 = vpop.eup %3116 }
 0x14c   : > { %v1247_v5 = vpack.c.bf16 %v3117_v4, %v3115_v3 }
 0x14e   : > { %2830 = vmatmul.mubr.bf16.vlgmr.msra.gmra.mrb[12].mxu1 %v1247_v5 }
 0x14f   : > { %2852 = vmatpush3.bf16.msra.mxu1 %v1575_v46  ;;  %v3047_v46 = vld [vmem:[%s3928_s15 + $0x7c] ss:$28 sps:$4 sm:$0xff]  }
 0x221   : > { %v2831_v11 = vpop.f32.mrb[12].mxu1 }
 0x222   : > { %v1362_v12 = vadd.f32 %v2831_v11, %v2584_v10  ;;  %v1353_v13 = vpop.f32.mrb[13].mxu1 }
 0x223   : > { %v1354_v14 = vadd.f32 %v2584_v10, %v1353_v13  ;;  %v2832_v15 = vpop.f32.mrb[14].mxu1 }
 0x224   : > { %3118 = vtanh.f32 %v1362_v12  ;;  %v1365_v16 = vadd.f32 %v2832_v15, %v2584_v10  ;;  %v1356_v17 = vpop.f32.mrb[15].mxu1  ;;  %v3026_v15 = vld [vmem:[%s3926_s13] sm:$0xff]  }
 0x225   : > { %3120 = vtanh.f32 %v1354_v14  ;;  %v1357_v18 = vadd.f32 %v2584_v10, %v1356_v17  ;;  %2863 = vmatprep.subr.bf16.mxu1 %v3026_v15  ;;  %v3028_v17 = vld [vmem:[%s3926_s13 + $0x10] sm:$0xff]  }
 0x226   : > { %3122 = vtanh.f32 %v1365_v16  ;;  %v3027_v16 = vld [vmem:[%s3926_s13 + $0x8] sm:$0xff]  }
 0x227   : > { %3124 = vtanh.f32 %v1357_v18  ;;  %v3029_v18 = vld [vmem:[%s3926_s13 + $0x18] sm:$0xff]  }
 0x22e   : > { %v3119_v19 = vpop.eup %3118 }
 0x22f   : > { %v3121_v20 = vpop.eup %3120 }
 0x230   : > { %v3123_v21 = vpop.eup %3122 }
 0x231   : > { %v3125_v22 = vpop.eup %3124  ;;  %v1373_v23 = vpack.c.bf16 %v3123_v21, %v3119_v19  ;;  %v3030_v19 = vld [vmem:[%s3928_s15] ss:$28 sps:$4 sm:$0xff]   ;;  %v3035_v21 = vld [vmem:[%s3928_s15 + $0xc] ss:$28 sps:$4 sm:$0xff]  }
 0x232   : > { %v1372_v24 = vpack.c.bf16 %v3125_v22, %v3121_v20  ;;  %v3032_v20 = vld [vmem:[%s3928_s15 + $0x4] ss:$28 sps:$4 sm:$0xff]   ;;  %v3038_v22 = vld [vmem:[%s3928_s15 + $0x3c] ss:$28 sps:$4 sm:$0xff]  }
 0x234   : > { %2841 = vmatprep.mubr.msk.bf16.mxu0 %vm1413_vm1, %v1372_v24  ;;  %v3044_v24 = vld [vmem:[%s3928_s15 + $0x74] ss:$28 sps:$4 sm:$0xff]  }
 0x235   : > { %2842 = vmatmul.mubr.msk.bf16.vlgmr.msra.gmra.mrb[16].mxu0 %vm1413_vm1, %v1373_v23  ;;  %v3036_v23 = vld [vmem:[%s3928_s15 + $0x38] ss:$28 sps:$4 sm:$0xff]  }
 0x236   : > { %2846 = vmatpush3.bf16.msra.mxu0 %v1498_v26  ;;  %v3050_v26 = vld [vmem:[%s3928_s15 + $0xac] ss:$28 sps:$4 sm:$0xff]  }
 0x237   : > { %2896 = vmatprep.subr.msk.bf16.mxu0 %vm1496_vm2, %v3025_v62  ;;  %v3074_v62 = vld [vmem:[%s3928_s15 + $0x18c] ss:$28 sps:$4 sm:$0xff]  }
 0x308   : > { %v2843_v28 = vpop.f32.mrb[16].mxu0 }
 0x309   : > { %v1463_v29 = vadd.f32 %v2843_v28, %v2593_v27  ;;  %v1454_v30 = vpop.f32.mrb[17].mxu0  ;;  %v2607_v28 = vld [vmem:[%s3925_s12] ss:$0 sm:$0xff] }
 0x30a   : > { %v1455_v31 = vadd.f32 %v2593_v27, %v1454_v30  ;;  %v2844_v32 = vpop.f32.mrb[18].mxu0 }
 0x30b   : > { %3126 = vtanh.f32 %v1463_v29  ;;  %v1466_v33 = vadd.f32 %v2844_v32, %v2593_v27  ;;  %v1457_v34 = vpop.f32.mrb[19].mxu0 }
 0x30c   : > { %3128 = vtanh.f32 %v1455_v31  ;;  %v1458_v35 = vadd.f32 %v2593_v27, %v1457_v34  ;;  %v3048_v27 = vld [vmem:[%s3928_s15 + $0xa8] ss:$28 sps:$4 sm:$0xff]  }
 0x30d   : > { %3130 = vtanh.f32 %v1466_v33 }
 0x30e   : > { %3132 = vtanh.f32 %v1458_v35 }
 0x315   : > { %v3127_v36 = vpop.eup %3126 }
 0x316   : > { %v3129_v37 = vpop.eup %3128 }
 0x317   : > { %v3131_v38 = vpop.eup %3130 }
 0x318   : > { %v3133_v39 = vpop.eup %3132  ;;  %v1474_v40 = vpack.c.bf16 %v3131_v38, %v3127_v36 }
 0x319   : > { %v1473_v41 = vpack.c.bf16 %v3133_v39, %v3129_v37 }
 0x31b   : > { %2847 = vmatprep.mubr.msk.bf16.mxu0 %vm1489_vm3, %v1473_v41 }
 0x31c   : > { %2848 = vmatmul.mubr.msk.bf16.vlgmr.msra.gmra.mrb[20].mxu0 %vm1489_vm3, %v1474_v40 }
 0x31d   : > { %2858 = vmatpush3.bf16.msra.mxu0 %v1653_v63  ;;  %v3077_v63 = vld [vmem:[%s3928_s15 + $0x194] ss:$28 sps:$4 sm:$0xff]  }
 0x31e   : > { %2199 = vmatprep.subr.bf16.mxu0 %v3032_v20 }
 0x3ef   : > { %v2849_v48 = vpop.f32.mrb[20].mxu0 }
 0x3f0   : > { %v1543_v49 = vadd.f32 %v2849_v48, %v2600_v47  ;;  %v1534_v50 = vpop.f32.mrb[21].mxu0  ;;  %v3053_v48 = vld [vmem:[%s3928_s15 + $0xb4] ss:$28 sps:$4 sm:$0xff]  }
 0x3f1   : > { %v1535_v51 = vadd.f32 %v2600_v47, %v1534_v50  ;;  %v2850_v52 = vpop.f32.mrb[22].mxu0  ;;  %v3056_v50 = vld [vmem:[%s3928_s15 + $0xe4] ss:$28 sps:$4 sm:$0xff]  }
 0x3f2   : > { %3134 = vtanh.f32 %v1543_v49  ;;  %v1546_v53 = vadd.f32 %v2850_v52, %v2600_v47  ;;  %v1537_v54 = vpop.f32.mrb[23].mxu0  ;;  %v3051_v49 = vld [vmem:[%s3928_s15 + $0xb0] ss:$28 sps:$4 sm:$0xff]   ;;  %v3054_v52 = vld [vmem:[%s3928_s15 + $0xe0] ss:$28 sps:$4 sm:$0xff]  }
 0x3f3   : > { %3136 = vtanh.f32 %v1535_v51  ;;  %v1538_v55 = vadd.f32 %v2600_v47, %v1537_v54  ;;  %v3045_v47 = vld [vmem:[%s3928_s15 + $0x78] ss:$28 sps:$4 sm:$0xff]   ;;  %v3059_v51 = vld [vmem:[%s3928_s15 + $0xec] ss:$28 sps:$4 sm:$0xff]  }
 0x3f4   : > { %3138 = vtanh.f32 %v1546_v53  ;;  %v3057_v53 = vld [vmem:[%s3928_s15 + $0xe8] ss:$28 sps:$4 sm:$0xff]   ;;  %v3062_v54 = vld [vmem:[%s3928_s15 + $0x11c] ss:$28 sps:$4 sm:$0xff]  }
 0x3f5   : > { %3140 = vtanh.f32 %v1538_v55  ;;  %v3065_v55 = vld [vmem:[%s3928_s15 + $0x124] ss:$28 sps:$4 sm:$0xff]  }
 0x3fc   : > { %v3135_v56 = vpop.eup %3134 }
 0x3fd   : > { %v3137_v57 = vpop.eup %3136 }
 0x3fe   : > { %v3139_v58 = vpop.eup %3138 }
 0x3ff   : > { %v3141_v59 = vpop.eup %3140  ;;  %v1554_v60 = vpack.c.bf16 %v3139_v58, %v3135_v56  ;;  %v3060_v56 = vld [vmem:[%s3928_s15 + $0x118] ss:$28 sps:$4 sm:$0xff]  }
 0x400   : > { %v1553_v61 = vpack.c.bf16 %v3141_v59, %v3137_v57  ;;  %v3063_v57 = vld [vmem:[%s3928_s15 + $0x120] ss:$28 sps:$4 sm:$0xff]   ;;  %v3068_v58 = vld [vmem:[%s3928_s15 + $0x154] ss:$28 sps:$4 sm:$0xff]  }
 0x401   : > { %v3066_v59 = vld [vmem:[%s3928_s15 + $0x150] ss:$28 sps:$4 sm:$0xff]  }
 0x402   : > { %2853 = vmatprep.mubr.msk.bf16.mxu1 %vm1563_vm6, %v1553_v61  ;;  %v3071_v61 = vld [vmem:[%s3928_s15 + $0x15c] ss:$28 sps:$4 sm:$0xff]  }
 0x403   : > { %2854 = vmatmul.mubr.msk.bf16.vlgmr.msra.gmra.mrb[16].mxu1 %vm1563_vm6, %v1554_v60  ;;  %v3069_v60 = vld [vmem:[%s3928_s15 + $0x158] ss:$28 sps:$4 sm:$0xff]  }
 0x404   : > { %2864 = vmatpush3.bf16.msra.mxu1 %v3026_v15 }
 0x405   : > { %2865 = vmatprep.subr.bf16.mxu1 %v3027_v16 }
 0x408   : > { %2866 = vmatpush3.bf16.msra.mxu1 %v3027_v16 }
 0x409   : > { %2867 = vmatprep.subr.bf16.mxu1 %v3028_v17 }
 0x40c   : > { %2868 = vmatpush3.bf16.msra.mxu1 %v3028_v17 }
 0x40d   : > { %2869 = vmatprep.subr.bf16.mxu1 %v3029_v18 }
 0x410   : > { %2870 = vmatpush3.bf16.msra.mxu1 %v3029_v18  ;;  %v3078_v18 = vld [vmem:[%s3928_s15 + $0x10] ss:$28 sps:$4 sm:$0xff]  }
 0x411   : > { %2252 = vmatprep.subr.bf16.mxu1 %v3035_v21  ;;  %v3084_v21 = vld [vmem:[%s3928_s15 + $0x4c] ss:$28 sps:$4 sm:$0xff]  }
 0x4d6   : > { %v2855_v1 = vpop.f32.mrb[16].mxu1 }
 0x4d7   : > { %v1620_v2 = vadd.f32 %v2855_v1, %v2604_v0  ;;  %v1611_v3 = vpop.f32.mrb[17].mxu1  ;;  %v3072_v1 = vld [vmem:[%s3928_s15 + $0x188] ss:$28 sps:$4 sm:$0xff]  }
 0x4d8   : > { %v1612_v4 = vadd.f32 %v2604_v0, %v1611_v3  ;;  %v2856_v5 = vpop.f32.mrb[18].mxu1  ;;  %v3080_v3 = vld [vmem:[%s3928_s15 + $0x14] ss:$28 sps:$4 sm:$0xff]  }
 0x4d9   : > { %3142 = vtanh.f32 %v1620_v2  ;;  %v1623_v6 = vadd.f32 %v2856_v5, %v2604_v0  ;;  %v1614_v7 = vpop.f32.mrb[19].mxu1  ;;  %v3075_v2 = vld [vmem:[%s3928_s15 + $0x190] ss:$28 sps:$4 sm:$0xff]   ;;  %v2611_v5 = vld [vmem:[%s3927_s14] ss:$0 sm:$0xff] }
 0x4da   : > { %3144 = vtanh.f32 %v1612_v4  ;;  %v1615_v8 = vadd.f32 %v2604_v0, %v1614_v7  ;;  %v3231_v0 = vmov 0   ;;  %v3081_v4 = vld [vmem:[%s3928_s15 + $0x18] ss:$28 sps:$4 sm:$0xff]  }
 0x4db   : > { %3146 = vtanh.f32 %v1623_v6 }
 0x4dc   : > { %3148 = vtanh.f32 %v1615_v8 }
 0x4e3   : > { %v3143_v9 = vpop.eup %3142 }
 0x4e4   : > { %v3145_v10 = vpop.eup %3144 }
 0x4e5   : > { %v3147_v11 = vpop.eup %3146 }
 0x4e6   : > { %v3149_v12 = vpop.eup %3148  ;;  %v1631_v13 = vpack.c.bf16 %v3147_v11, %v3143_v9 }
 0x4e7   : > { %v1630_v14 = vpack.c.bf16 %v3149_v12, %v3145_v10 }
 0x4e9   : > { %2859 = vmatprep.mubr.msk.bf16.mxu0 %vm1489_vm3, %v1630_v14 }
 0x4ea   : > { %2860 = vmatmul.mubr.msk.bf16.vlgmr.msra.gmra.mrb[24].mxu0 %vm1489_vm3, %v1631_v13 }
 0x4eb   : > { %2200 = vmatpush1.bf16.msra.mxu0 %v3030_v19  ;;  %2231 = vmatprep.mubr.bf16.mxu0 %v3231_v0 }
 0x4ec   : > { %2201 = vmatprep.subr.bf16.mxu0 %v3038_v22  ;;  %v3085_v22 = vld [vmem:[%s3928_s15 + $0x50] ss:$28 sps:$4 sm:$0xff]  }
 0x4ef   : > { %2202 = vmatpush1.bf16.msra.mxu0 %v3036_v23  ;;  %v3082_v23 = vld [vmem:[%s3928_s15 + $0x48] ss:$28 sps:$4 sm:$0xff]  }
 0x4f0   : > { %2203 = vmatprep.subr.bf16.mxu0 %v3044_v24  ;;  %v3088_v24 = vld [vmem:[%s3928_s15 + $0x84] ss:$28 sps:$4 sm:$0xff]  }
 0x4f3   : > { %2204 = vmatpush1.bf16.msra.mxu0 %v3042_v25  ;;  %v3089_v25 = vld [vmem:[%s3928_s15 + $0x88] ss:$28 sps:$4 sm:$0xff]  }
 0x4f4   : > { %2205 = vmatprep.subr.bf16.mxu0 %v3050_v26  ;;  %v3086_v26 = vld [vmem:[%s3928_s15 + $0x80] ss:$28 sps:$4 sm:$0xff]  }
 0x4f7   : > { %2206 = vmatpush1.bf16.msra.mxu0 %v3048_v27  ;;  %v3092_v27 = vld [vmem:[%s3928_s15 + $0xbc] ss:$28 sps:$4 sm:$0xff]  }
 0x4f8   : > { %2207 = vmatprep.subr.bf16.mxu0 %v3056_v50 }
 0x4fb   : > { %2208 = vmatpush1.bf16.msra.mxu0 %v3054_v52 }
 0x4fc   : > { %2209 = vmatprep.subr.bf16.mxu0 %v3062_v54 }
 0x4ff   : > { %2210 = vmatpush1.bf16.msra.mxu0 %v3060_v56 }
 0x500   : > { %2211 = vmatprep.subr.bf16.mxu0 %v3068_v58 }
 0x503   : > { %2212 = vmatpush1.bf16.msra.mxu0 %v3066_v59 }
 0x504   : > { %2213 = vmatprep.subr.bf16.mxu0 %v3074_v62 }
 0x507   : > { %2214 = vmatpush1.bf16.msra.mxu0 %v3072_v1 }
 0x508   : > { %2305 = vmatprep.subr.bf16.mxu0 %v3080_v3 }
 0x5bd   : > { %v2861_v29 = vpop.f32.mrb[24].mxu0 }
 0x5be   : > { %v1698_v30 = vadd.f32 %v2861_v29, %v2607_v28  ;;  %v1689_v31 = vpop.f32.mrb[25].mxu0  ;;  %v3090_v29 = vld [vmem:[%s3928_s15 + $0xb8] ss:$28 sps:$4 sm:$0xff]  }
 0x5bf   : > { %v1690_v32 = vadd.f32 %v2607_v28, %v1689_v31  ;;  %v2862_v33 = vpop.f32.mrb[26].mxu0  ;;  %v3097_v31 = vld [vmem:[%s3928_s15 + $0xf8] ss:$28 sps:$4 sm:$0xff]  }
 0x5c0   : > { %3150 = vtanh.f32 %v1698_v30  ;;  %v1701_v34 = vadd.f32 %v2862_v33, %v2607_v28  ;;  %v1692_v35 = vpop.f32.mrb[27].mxu0  ;;  %v3096_v30 = vld [vmem:[%s3928_s15 + $0xf4] ss:$28 sps:$4 sm:$0xff]   ;;  %v3100_v33 = vld [vmem:[%s3928_s15 + $0x12c] ss:$28 sps:$4 sm:$0xff]  }
 0x5c1   : > { %3152 = vtanh.f32 %v1690_v32  ;;  %v1693_v36 = vadd.f32 %v2607_v28, %v1692_v35  ;;  %v3093_v28 = vld [vmem:[%s3928_s15 + $0xc0] ss:$28 sps:$4 sm:$0xff]   ;;  %v3094_v32 = vld [vmem:[%s3928_s15 + $0xf0] ss:$28 sps:$4 sm:$0xff]   ;;  %v3098_v35 = vld [vmem:[%s3928_s15 + $0x128] ss:$28 sps:$4 sm:$0xff]  }
 0x5c2   : > { %3154 = vtanh.f32 %v1701_v34  ;;  %v3101_v34 = vld [vmem:[%s3928_s15 + $0x130] ss:$28 sps:$4 sm:$0xff]  }
 0x5c3   : > { %3156 = vtanh.f32 %v1693_v36  ;;  %v3104_v36 = vld [vmem:[%s3928_s15 + $0x164] ss:$28 sps:$4 sm:$0xff]  }
 0x5ca   : > { %v3151_v37 = vpop.eup %3150 }
 0x5cb   : > { %v3153_v38 = vpop.eup %3152 }
 0x5cc   : > { %v3155_v39 = vpop.eup %3154 }
 0x5cd   : > { %v3157_v40 = vpop.eup %3156  ;;  %v1709_v41 = vpack.c.bf16 %v3155_v39, %v3151_v37  ;;  %v3105_v37 = vld [vmem:[%s3928_s15 + $0x168] ss:$28 sps:$4 sm:$0xff]   ;;  %v3108_v39 = vld [vmem:[%s3928_s15 + $0x19c] ss:$28 sps:$4 sm:$0xff]  }
 0x5ce   : > { %v1708_v42 = vpack.c.bf16 %v3157_v40, %v3153_v38  ;;  %v3102_v38 = vld [vmem:[%s3928_s15 + $0x160] ss:$28 sps:$4 sm:$0xff]  }
 0x5cf   : > { %v3109_v40 = vld [vmem:[%s3928_s15 + $0x1a0] ss:$28 sps:$4 sm:$0xff]  }
 0x5d0   : > { %2871 = vmatprep.mubr.msk.bf16.mxu1 %vm1413_vm1, %v1708_v42  ;;  %v1876_v42 = vlaneseq }
 0x5d1   : > { %2872 = vmatmul.mubr.msk.bf16.vlgmr.msra.gmra.mrb[20].mxu1 %vm1413_vm1, %v1709_v41  ;;  %v3106_v41 = vld [vmem:[%s3928_s15 + $0x198] ss:$28 sps:$4 sm:$0xff]  }
 0x5d2   : > { %2253 = vmatpush1.bf16.msra.mxu1 %v3033_v43  ;;  %2284 = vmatprep.mubr.bf16.mxu1 %v3231_v0  ;;  %v3812_v43 = vshrl.u32 %v1876_v42, 7 }
 0x5d3   : > { %2254 = vmatprep.subr.bf16.mxu1 %v3041_v44 }
 0x5d4   : > { %v1878_v44 = vsub.s32 0, %v3812_v43 }
 0x5d6   : > { %2255 = vmatpush1.bf16.msra.mxu1 %v3039_v45  ;;  %v1886_v45 = vsub.s32 2, %v3812_v43 }
 0x5d7   : > { %2256 = vmatprep.subr.bf16.mxu1 %v3047_v46  ;;  %v1874_v46 = vld [vmem:[%s3929_s16] sm:$0x7f] }
 0x5d8   : > { %v1887_v50 = vrot.slane %v1874_v46, %v1886_v45 }
 0x5da   : > { %2257 = vmatpush1.bf16.msra.mxu1 %v3045_v47  ;;  %v1882_v47 = vsub.s32 1, %v3812_v43 }
 0x5db   : > { %2258 = vmatprep.subr.bf16.mxu1 %v3053_v48  ;;  %v1890_v48 = vsub.s32 3, %v3812_v43 }
 0x5dd   : > { %v1891_v52 = vrot.slane %v1874_v46, %v1890_v48 }
 0x5de   : > { %2259 = vmatpush1.bf16.msra.mxu1 %v3051_v49  ;;  %v1879_v49 = vrot.slane %v1874_v46, %v1878_v44 }
 0x5df   : > { %2260 = vmatprep.subr.bf16.mxu1 %v3059_v51  ;;  %v1883_v51 = vrot.slane %v1874_v46, %v1882_v47 }
 0x5e2   : > { %2261 = vmatpush1.bf16.msra.mxu1 %v3057_v53 }
 0x5e3   : > { %2262 = vmatprep.subr.bf16.mxu1 %v3065_v55 }
 0x5e6   : > { %2263 = vmatpush1.bf16.msra.mxu1 %v3063_v57 }
 0x5e7   : > { %2264 = vmatprep.subr.bf16.mxu1 %v3071_v61 }
 0x5ea   : > { %2265 = vmatpush1.bf16.msra.mxu1 %v3069_v60 }
 0x5eb   : > { %2266 = vmatprep.subr.bf16.mxu1 %v3077_v63 }
 0x5ee   : > { %2267 = vmatpush1.bf16.msra.mxu1 %v3075_v2 }
 0x5ef   : > { %2875 = vmatprep.subr.bf16.mxu1 %v3081_v4 }
 0x6a4   : > { %v2873_v6 = vpop.f32.mrb[20].mxu1 }
 0x6a5   : > { %v1798_v7 = vadd.f32 %v2873_v6, %v2611_v5  ;;  %v1789_v8 = vpop.f32.mrb[21].mxu1 }
 0x6a6   : > { %v1790_v9 = vadd.f32 %v2611_v5, %v1789_v8  ;;  %v2874_v10 = vpop.f32.mrb[22].mxu1 }
 0x6a7   : > { %3158 = vtanh.f32 %v1798_v7  ;;  %v1801_v11 = vadd.f32 %v2874_v10, %v2611_v5  ;;  %v1792_v12 = vpop.f32.mrb[23].mxu1 }
 0x6a8   : > { %3160 = vtanh.f32 %v1790_v9  ;;  %v1793_v13 = vadd.f32 %v2611_v5, %v1792_v12 }
 0x6a9   : > { %3162 = vtanh.f32 %v1801_v11 }
 0x6aa   : > { %3164 = vtanh.f32 %v1793_v13 }
 0x6b1   : > { %v3159_v14 = vpop.eup %3158 }
 0x6b2   : > { %v3161_v15 = vpop.eup %3160 }
 0x6b3   : > { %v3163_v16 = vpop.eup %3162 }
 0x6b4   : > { %v3165_v17 = vpop.eup %3164  ;;  %v3739_v19 = vpack.c.bf16 %v3163_v16, %v3159_v14 }
 0x6b5   : > { %v1808_v20 = vpack.c.bf16 %v3165_v17, %v3161_v15 }
 0x6b7   : > { %2232 = vmatmul.mubr.bf16.vlgmr.msra.gmra.mrb[28].mxu0 %v1808_v20  ;;  %2285 = vmatmul.mubr.bf16.vlgmr.msra.gmra.mrb[24].mxu1 %v1808_v20 }
 0x6b8   : > { %2306 = vmatpush1.bf16.msra.mxu0 %v3078_v18  ;;  %2876 = vmatpush3.bf16.msra.mxu1 %v3081_v4 }
 0x6b9   : > { %2307 = vmatprep.subr.bf16.mxu0 %v3084_v21  ;;  %2877 = vmatprep.subr.bf16.mxu1 %v3085_v22  ;;  %v1894_v21 = vsub.s32 4, %v3812_v43 }
 0x6ba   : > { %2241 = vmatprep.mubr.bf16.mxu0 %v3231_v0  ;;  %2294 = vmatprep.mubr.bf16.mxu1 %v3231_v0 }
 0x6bc   : > { %2308 = vmatpush1.bf16.msra.mxu0 %v3082_v23  ;;  %2878 = vmatpush3.bf16.msra.mxu1 %v3085_v22  ;;  %v1902_v22 = vsub.s32 6, %v3812_v43  ;;  %v1898_v23 = vsub.s32 5, %v3812_v43 }
 0x6bd   : > { %2309 = vmatprep.subr.bf16.mxu0 %v3088_v24  ;;  %2879 = vmatprep.subr.bf16.mxu1 %v3089_v25  ;;  %v1895_v24 = vrot.slane %v1874_v46, %v1894_v21 }
 0x6bf   : > { %2242 = vmatmul.mubr.bf16.gmra.mrb[32].mxu0 %v3739_v19  ;;  %2295 = vmatmul.mubr.bf16.gmra.mrb[28].mxu1 %v3739_v19 }
 0x6c0   : > { %2310 = vmatpush1.bf16.msra.mxu0 %v3086_v26  ;;  %2880 = vmatpush3.bf16.msra.mxu1 %v3089_v25  ;;  %v1903_v25 = vrot.slane %v1874_v46, %v1902_v22  ;;  %v1899_v26 = vrot.slane %v1874_v46, %v1898_v23 }
 0x6c1   : > { %2891 = vmatprep.mubr.bf16.mxu1 %v1808_v20  ;;  %2311 = vmatprep.subr.bf16.mxu0 %v3092_v27 }
 0x6c2   : > { %2881 = vmatprep.subr.bf16.mxu1 %v3093_v28  ;;  %2337 = vmatprep.mubr.bf16.mxu0 %v3231_v0 }
 0x6c4   : > { %2312 = vmatpush1.bf16.msra.mxu0 %v3090_v29  ;;  %2882 = vmatpush3.bf16.msra.mxu1 %v3093_v28 }
 0x6c5   : > { %2313 = vmatprep.subr.bf16.mxu0 %v3096_v30  ;;  %2883 = vmatprep.subr.bf16.mxu1 %v3097_v31 }
 0x6c8   : > { %2314 = vmatpush1.bf16.msra.mxu0 %v3094_v32  ;;  %2884 = vmatpush3.bf16.msra.mxu1 %v3097_v31 }
 0x6c9   : > { %2315 = vmatprep.subr.bf16.mxu0 %v3100_v33  ;;  %2885 = vmatprep.subr.bf16.mxu1 %v3101_v34 }
 0x6cc   : > { %2316 = vmatpush1.bf16.msra.mxu0 %v3098_v35  ;;  %2886 = vmatpush3.bf16.msra.mxu1 %v3101_v34 }
 0x6cd   : > { %2317 = vmatprep.subr.bf16.mxu0 %v3104_v36  ;;  %2887 = vmatprep.subr.bf16.mxu1 %v3105_v37 }
 0x6d0   : > { %2318 = vmatpush1.bf16.msra.mxu0 %v3102_v38  ;;  %2888 = vmatpush3.bf16.msra.mxu1 %v3105_v37 }
 0x6d1   : > { %2319 = vmatprep.subr.bf16.mxu0 %v3108_v39  ;;  %2889 = vmatprep.subr.bf16.mxu1 %v3109_v40 }
 0x6d4   : > { %2320 = vmatpush1.bf16.msra.mxu0 %v3106_v41  ;;  %2890 = vmatpush3.bf16.msra.mxu1 %v3109_v40 }
 0x6d7   : > { %2338 = vmatmul.mubr.bf16.vlgmr.msra.gmra.mrb[36].mxu0 %v1808_v20  ;;  %2892 = vmatmul.mubr.bf16.vlgmr.msra.gmra.mrb[32].mxu1 %v3739_v19 }
 0x6d8   : > { %2347 = vmatprep.mubr.bf16.mxu0 %v3231_v0 }
 0x6df   : > { %2348 = vmatmul.mubr.bf16.gmra.mrb[40].mxu0 %v3739_v19 }
 0x78a   : > { %v2233_v53 = vpop.f32.mrb[28].mxu0  ;;  %v2286_v54 = vpop.f32.mrb[24].mxu1 }
 0x78b   : > { %v2234_v55 = vadd.f32 %v2233_v53, %v1879_v49  ;;  %v2287_v56 = vadd.f32 %v2286_v54, %v1887_v50  ;;  %v2235_v57 = vpop.f32.mrb[29].mxu0  ;;  %v2288_v58 = vpop.f32.mrb[25].mxu1 }
 0x78c   : > { %v2236_v59 = vadd.f32 %v2235_v57, %v1883_v51  ;;  %v2289_v60 = vadd.f32 %v2288_v58, %v1891_v52  ;;  %v2237_v61 = vpop.f32.mrb[30].mxu0  ;;  %v2290_v62 = vpop.f32.mrb[26].mxu1 }
 0x78d   : > { %2407 = vst [vmem:[%s3824_s21] sm:$0xff] %v2234_v55  ;;  %2409 = vst [vmem:[%s3824_s21 + $0x10] sm:$0xff] %v2287_v56  ;;  %v2238_v63 = vadd.f32 %v2237_v61, %v1879_v49  ;;  %v2291_v0 = vadd.f32 %v2290_v62, %v1887_v50  ;;  %v2239_v1 = vpop.f32.mrb[31].mxu0  ;;  %v2292_v2 = vpop.f32.mrb[27].mxu1 }
 0x78e   : > { %2408 = vst [vmem:[%s3824_s21 + $0x8] sm:$0xff] %v2236_v59  ;;  %2410 = vst [vmem:[%s3824_s21 + $0x18] sm:$0xff] %v2289_v60  ;;  %v2240_v3 = vadd.f32 %v2239_v1, %v1883_v51  ;;  %v2293_v4 = vadd.f32 %v2292_v2, %v1891_v52 }
 0x78f   : > { %2414 = vst [vmem:[%s3824_s21 + $0x38] sm:$0xff] %v2238_v63  ;;  %2416 = vst [vmem:[%s3824_s21 + $0x48] sm:$0xff] %v2291_v0 }
 0x790   : > { %2415 = vst [vmem:[%s3824_s21 + $0x40] sm:$0xff] %v2240_v3  ;;  %2417 = vst [vmem:[%s3824_s21 + $0x50] sm:$0xff] %v2293_v4 }
 0x792   : > { %v2243_v5 = vpop.f32.mrb[32].mxu0  ;;  %v2296_v6 = vpop.f32.mrb[28].mxu1 }
 0x793   : > { %v2244_v7 = vadd.f32 %v2243_v5, %v1879_v49  ;;  %v2297_v8 = vadd.f32 %v2296_v6, %v1887_v50  ;;  %v2245_v9 = vpop.f32.mrb[33].mxu0  ;;  %v2298_v10 = vpop.f32.mrb[29].mxu1 }
 0x794   : > { %v2246_v11 = vadd.f32 %v2245_v9, %v1883_v51  ;;  %v2299_v12 = vadd.f32 %v2298_v10, %v1891_v52  ;;  %v2247_v13 = vpop.f32.mrb[34].mxu0  ;;  %v2300_v14 = vpop.f32.mrb[30].mxu1 }
 0x795   : > { %2421 = vst [vmem:[%s3824_s21 + $0x70] sm:$0xff] %v2244_v7  ;;  %2423 = vst [vmem:[%s3824_s21 + $0x80] sm:$0xff] %v2297_v8  ;;  %v2248_v15 = vadd.f32 %v2247_v13, %v1879_v49  ;;  %v2301_v16 = vadd.f32 %v2300_v14, %v1887_v50  ;;  %v2249_v17 = vpop.f32.mrb[35].mxu0  ;;  %v2302_v18 = vpop.f32.mrb[31].mxu1 }
 0x796   : > { %2422 = vst [vmem:[%s3824_s21 + $0x78] sm:$0xff] %v2246_v11  ;;  %2424 = vst [vmem:[%s3824_s21 + $0x88] sm:$0xff] %v2299_v12  ;;  %v2250_v19 = vadd.f32 %v2249_v17, %v1883_v51  ;;  %v2303_v20 = vadd.f32 %v2302_v18, %v1891_v52 }
 0x797   : > { %2428 = vst [vmem:[%s3824_s21 + $0xa8] sm:$0xff] %v2248_v15  ;;  %2430 = vst [vmem:[%s3824_s21 + $0xb8] sm:$0xff] %v2301_v16 }
 0x798   : > { %2429 = vst [vmem:[%s3824_s21 + $0xb0] sm:$0xff] %v2250_v19  ;;  %2431 = vst [vmem:[%s3824_s21 + $0xc0] sm:$0xff] %v2303_v20 }
 0x7aa   : > { %v2339_v27 = vpop.f32.mrb[36].mxu0  ;;  %v2893_v28 = vpop.f32.mrb[32].mxu1 }
 0x7ab   : > { %v2340_v29 = vadd.f32 %v2339_v27, %v1895_v24  ;;  %v2401_v30 = vadd.f32 %v2893_v28, %v1903_v25  ;;  %v2341_v31 = vpop.f32.mrb[37].mxu0  ;;  %v2392_v32 = vpop.f32.mrb[33].mxu1 }
 0x7ac   : > { %v2342_v33 = vadd.f32 %v2341_v31, %v1899_v26  ;;  %v2393_v34 = vadd.f32 %v2392_v32, %v1903_v25  ;;  %v2343_v35 = vpop.f32.mrb[38].mxu0  ;;  %v2894_v36 = vpop.f32.mrb[34].mxu1 }
 0x7ad   : > { %2411 = vst [vmem:[%s3824_s21 + $0x20] sm:$0xff] %v2340_v29  ;;  %2427 = vst.msk [vmem:[%s3824_s21 + $0xa0] sm:$0xff] %vm1039_vm0, %v2401_v30  ;;  %v2344_v37 = vadd.f32 %v2343_v35, %v1895_v24  ;;  %v2404_v38 = vadd.f32 %v2894_v36, %v1903_v25  ;;  %v2345_v39 = vpop.f32.mrb[39].mxu0  ;;  %v2395_v40 = vpop.f32.mrb[35].mxu1 }
 0x7ae   : > { %2412 = vst [vmem:[%s3824_s21 + $0x28] sm:$0xff] %v2342_v33  ;;  %2413 = vst.msk [vmem:[%s3824_s21 + $0x30] sm:$0xff] %vm1039_vm0, %v2393_v34  ;;  %v2346_v41 = vadd.f32 %v2345_v39, %v1899_v26  ;;  %v2396_v42 = vadd.f32 %v2395_v40, %v1903_v25 }
 0x7af   : > { %2418 = vst [vmem:[%s3824_s21 + $0x58] sm:$0xff] %v2344_v37  ;;  %2434 = vst.msk [vmem:[%s3824_s21 + $0xd8] sm:$0xff] %vm1039_vm0, %v2404_v38 }
 0x7b0   : > { %2419 = vst [vmem:[%s3824_s21 + $0x60] sm:$0xff] %v2346_v41  ;;  %2420 = vst.msk [vmem:[%s3824_s21 + $0x68] sm:$0xff] %vm1039_vm0, %v2396_v42 }
 0x7b2   : > { %v2349_v43 = vpop.f32.mrb[40].mxu0 }
 0x7b3   : > { %v2350_v44 = vadd.f32 %v2349_v43, %v1895_v24  ;;  %v2351_v45 = vpop.f32.mrb[41].mxu0 }
 0x7b4   : > { %v2352_v46 = vadd.f32 %v2351_v45, %v1899_v26  ;;  %v2353_v47 = vpop.f32.mrb[42].mxu0 }
 0x7b5   : > { %2425 = vst [vmem:[%s3824_s21 + $0x90] sm:$0xff] %v2350_v44  ;;  %v2354_v48 = vadd.f32 %v2353_v47, %v1895_v24  ;;  %v2355_v49 = vpop.f32.mrb[43].mxu0 }
 0x7b6   : > { %2426 = vst [vmem:[%s3824_s21 + $0x98] sm:$0xff] %v2352_v46  ;;  %v2356_v50 = vadd.f32 %v2355_v49, %v1899_v26 }
 0x7b7   : > { %2432 = vst [vmem:[%s3824_s21 + $0xc8] sm:$0xff] %v2354_v48 }
 0x7b8   : > { %2433 = vst [vmem:[%s3824_s21 + $0xd0] sm:$0xff] %v2356_v50 }
 0x7b9   : > { %3179 = shalt.err (!%p3176_p3)
}
 0x7ba   : > { %s3180_s24 = scalar_lea.hbm %s3863_s27, 3584  ;;  %s3184_s19 = scalar_lea.hbm %s3953_s0, 7168 }
 0x7bb   : > { %p3181_p4 = scmp.ne.s32.totalorder %s3863_s27, %s3180_s24  ;;  %p3185_p9 = scmp.lt.u32.totalorder %s3863_s27, %s3953_s0 }
 0x7bc   : > { %p3186_p10 = scmp.lt.u32.totalorder %s3184_s19, %s3180_s24  ;;  %p3188_p12 = scmp.lt.u32.totalorder %s3180_s24, %s3863_s27 }
 0x7bd   : > { %p3182_p7 = pnand %p3181_p4, %p3363_p5 }
 0x7be   : > { %p3187_p11 = por %p3186_p10, %p3185_p9 }
 0x7bf   : > { %p3183_p8 = pneg %p3182_p7 }
 0x7c0   : > { %p3189_p13 = por %p3188_p12, %p3187_p11 }
 0x7c2   : > { %p3190_p0 = pnand %p3189_p13, %p3183_p8 }
 0x7c4   : > { %3193 = shalt.err (!%p3190_p0)
}
 0x7c5   : > { %s3233_s17 = smov 896   ;;  %s3234_s30 = smov 56  }
 0x7c6   : > { %2900 = dma.vmem_to_hbm [thread:$0]  (%p3363_p5), %s3865_s20, 3584, %s3863_s27, %s3872_s28, %s3233_s17, %s3233_s17, %s3234_s30  }
 0x7c7 PF: > { %s3954_s22 = sld [smem:[#allocation7_spill]]  ;;  %s3955_s21 = sld [smem:[#allocation5_spill]] }
 0x7cd   : > { %p2906_p1 = scmp.ge.s32.totalorder %s3954_s22, 2  ;;  %s2465_s26 = sand.u32 1, %s3955_s21  }
 0x7ce   : > { %s2466_s24 = scalar_lea.sflag [#allocation3], %s2465_s26 }
 0x7cf   : > { %p2903_p2 = pnand %p2906_p1, %p3367_p6 }
 0x7d1   : > { %3211 = dma.done.wait (!%p2903_p2), %s2466_s24, 3584  }
 0x7d2   : > { %3213 = vsyncadd (!%p2903_p2), %s2466_s24, 4294963712  ;;  %s3957_s27 = sld [smem:[#allocation8_spill]]  ;;  %s3958_s19 = sld [smem:[#allocation6_spill]] }
 0x7d3   : > { %s3959_s26 = sld [smem:[#allocation9_spill]]  ;;  %s3960_s24 = smov %s3220_s25 }
 0x7d8   : > { %p27_p3 = scmp.ge.s32.totalorder %s3957_s27, 4   ;;  %s3961_s25 = smov %s3958_s19 }
 0x7da   :  { %29 = sbr.rel (!%p27_p3) target bundleno = 7 (0x7), region = 123 }
 0x7e1   :  { %2471 = vsyncpa [#allocation3], 1 }
 0x7e2   :  { %2473 = vsyncpa [#allocation3 + $0x1], 1 }

</bundles_post_ra>
